<compile_context>
chip_gen: v7x
topology: tpu7x:2x2x1
jax: 0.10.0
libtpu: 0.0.40
codegen_flags: <defaults>
</compile_context>

<pallas_src>
import math

import jax
import jax.numpy as jnp
from jax.experimental import pallas as pl
from jax.experimental.pallas import tpu as pltpu


def _gelu_exact(x):
    # PyTorch F.gelu default is the *exact* (erf) GELU.  Mosaic has no erf primitive,
    # so erf is evaluated with the Abramowitz-Stegun 7.1.26 rational approximation
    # (|error| < 1.5e-7); the exp() goes to the EUP, the rest is cheap VPU work.
    inv_sqrt2 = 0.7071067811865476
    z = x * inv_sqrt2
    a = jnp.abs(z)
    t = 1.0 / (1.0 + 0.3275911 * a)
    poly = t * (0.254829592 + t * (-0.284496736 + t * (1.421413741
                + t * (-1.453152027 + t * 1.061405429))))
    erf_abs = 1.0 - poly * jnp.exp(-a * a)
    erf = jnp.where(z < 0.0, -erf_abs, erf_abs)
    return x * 0.5 * (1.0 + erf)


def _convffn_block_kernel(x_ref, w1a_ref, b1a_ref, w1b_ref, b1b_ref,
                          w2a_ref, b2a_ref, w2b_ref, b2b_ref, o_ref):
    _, D, M, tn = x_ref.shape
    x = x_ref[0]                                             # (D, M, tn), input dtype

    # ---- conv_ffn1: per-d pointwise MLP (M -> M -> M), batched over the major dim d.
    h = jnp.einsum("dij,djn->din", w1a_ref[...], x,
                   preferred_element_type=jnp.float32)
    h = _gelu_exact(h + b1a_ref[...][:, :, None])
    y1 = jnp.einsum("dij,djn->din", w1b_ref[...], h,
                    preferred_element_type=jnp.float32)
    y1 = y1 + b1b_ref[...][:, :, None]                       # (D, M, tn), f32

    # ---- conv_ffn2: per-m pointwise MLP (D -> D -> D).  The (b d m n)->(b m d n)
    # permute is absorbed into the pre-permuted weights: contraction over the major
    # dim d, group index m stays in sublanes, output already in (d_out, m, n) order.
    pre = w2a_ref[0][:, :, None] * y1[0][None, :, :]
    for d in range(1, D):
        pre = pre + w2a_ref[d][:, :, None] * y1[d][None, :, :]
    g = _gelu_exact(pre + b2a_ref[...][:, :, None])
    y2 = w2b_ref[0][:, :, None] * g[0][None, :, :]
    for e in range(1, D):
        y2 = y2 + w2b_ref[e][:, :, None] * g[e][None, :, :]
    y2 = y2 + b2b_ref[...][:, :, None]                       # (D, M, tn), permuted back

    o_ref[0] = (x + y2).astype(o_ref.dtype)                  # fused residual add


def _choose_block_n(D, M, N):
    """Lane-dense N tiles when N is 128-aligned; otherwise the block must span N."""
    if N % 128 != 0:
        return N
    for tn in (512, 256, 128):
        # keep ~a dozen live (D, M, tn) f32 slabs well inside scoped VMEM
        if N % tn == 0 and 12 * D * M * tn * 4 <= 24 * 1024 * 1024:
            return tn
    return 128


def convffn_block_pallas(x, w1a, b1a, w1b, b1b, w2a, b2a, w2b, b2b):
    """x: (B,D,M,N); w1a/w1b: (D,M,M); b1a/b1b: (D,M); w2a/w2b: (M,D,D); b2a/b2b: (M,D)."""
    B, D, M, N = x.shape

    # Pre-permute the stage-2 weights so the kernel only ever indexes the leading
    # (major) dim: w2*_perm[d_in, d_out, m] = w2*[m, d_out, d_in]; biases -> (D, M).
    w2a_perm = jnp.transpose(w2a, (2, 1, 0))
    w2b_perm = jnp.transpose(w2b, (2, 1, 0))
    b2a_t = b2a.T
    b2b_t = b2b.T

    tn = _choose_block_n(D, M, N)
    grid = (B, N // tn)

    const3 = lambda b, n: (0, 0, 0)
    const2 = lambda b, n: (0, 0)

    return pl.pallas_call(
        _convffn_block_kernel,
        out_shape=jax.ShapeDtypeStruct((B, D, M, N), x.dtype),
        grid_spec=pltpu.PrefetchScalarGridSpec(
            num_scalar_prefetch=0,
            grid=grid,
            in_specs=[
                pl.BlockSpec((1, D, M, tn), lambda b, n: (b, 0, 0, n)),  # x
                pl.BlockSpec((D, M, M), const3),                          # w1a
                pl.BlockSpec((D, M), const2),                             # b1a
                pl.BlockSpec((D, M, M), const3),                          # w1b
                pl.BlockSpec((D, M), const2),                             # b1b
                pl.BlockSpec((D, D, M), const3),                          # w2a (permuted)
                pl.BlockSpec((D, M), const2),                             # b2a (transposed)
                pl.BlockSpec((D, D, M), const3),                          # w2b (permuted)
                pl.BlockSpec((D, M), const2),                             # b2b (transposed)
            ],
            out_specs=pl.BlockSpec((1, D, M, tn), lambda b, n: (b, 0, 0, n)),
        ),
        compiler_params=pltpu.CompilerParams(
            dimension_semantics=("parallel", "parallel")),
    )(x, w1a, b1a, w1b, b1b, w2a_perm, b2a_t, w2b_perm, b2b_t)


def convffn_block_reference(x, w1a, b1a, w1b, b1b, w2a, b2a, w2b, b2b):
    """Pure-JAX reference mirroring the PyTorch forward (exact-erf GELU; contractions
    done with explicit multiply+sum so the check is independent of matmul precision)."""
    gelu = lambda t: jax.nn.gelu(t, approximate=False)
    # conv_ffn1 (groups = D): per-d (M -> M) pointwise linears with GELU in between.
    h = jnp.sum(w1a[None, :, :, :, None] * x[:, :, None, :, :], axis=3) \
        + b1a[None, :, :, None]
    h = gelu(h)
    y1 = jnp.sum(w1b[None, :, :, :, None] * h[:, :, None, :, :], axis=3) \
        + b1b[None, :, :, None]
    # rearrange 'b (d m) n -> b d m n' then permute -> (b, m, d, n)
    z = jnp.transpose(y1, (0, 2, 1, 3))
    # conv_ffn2 (groups = M): per-m (D -> D) pointwise linears with GELU in between.
    g = jnp.sum(w2a[None, :, :, :, None] * z[:, :, None, :, :], axis=3) \
        + b2a[None, :, :, None]
    g = gelu(g)
    y2 = jnp.sum(w2b[None, :, :, :, None] * g[:, :, None, :, :], axis=3) \
        + b2b[None, :, :, None]
    # permute back and residual add
    return x + jnp.transpose(y2, (0, 2, 1, 3))


if __name__ == "__main__":
    # Small shapes consistent with the module: x is (batch, D, M, N).
    B, D, M, N = 2, 4, 8, 16
    key = jax.random.PRNGKey(0)
    ks = jax.random.split(key, 9)

    x = jax.random.normal(ks[0], (B, D, M, N), dtype=jnp.float32)

    # PyTorch Conv1d default init: U(-1/sqrt(fan_in), 1/sqrt(fan_in)),
    # fan_in = in_channels / groups * kernel_size.
    bnd1 = 1.0 / math.sqrt(M)   # conv_ffn1 convs: fan_in = M
    bnd2 = 1.0 / math.sqrt(D)   # conv_ffn2 convs: fan_in = D
    w1a = jax.random.uniform(ks[1], (D, M, M), jnp.float32, -bnd1, bnd1)
    b1a = jax.random.uniform(ks[2], (D, M), jnp.float32, -bnd1, bnd1)
    w1b = jax.random.uniform(ks[3], (D, M, M), jnp.float32, -bnd1, bnd1)
    b1b = jax.random.uniform(ks[4], (D, M), jnp.float32, -bnd1, bnd1)
    w2a = jax.random.uniform(ks[5], (M, D, D), jnp.float32, -bnd2, bnd2)
    b2a = jax.random.uniform(ks[6], (M, D), jnp.float32, -bnd2, bnd2)
    w2b = jax.random.uniform(ks[7], (M, D, D), jnp.float32, -bnd2, bnd2)
    b2b = jax.random.uniform(ks[8], (M, D), jnp.float32, -bnd2, bnd2)

    out = convffn_block_pallas(x, w1a, b1a, w1b, b1b, w2a, b2a, w2b, b2b)
    out = jax.block_until_ready(out)

    ref = convffn_block_reference(x, w1a, b1a, w1b, b1b, w2a, b2a, w2b, b2b)
    assert out.shape == (B, D, M, N)
    max_err = float(jnp.max(jnp.abs(out - ref)))
    # Tolerance covers possible reduced-precision f32 MXU passes; typically ~1e-6.
    assert max_err < 2e-3, max_err
    print("KERNEL_OK")
</pallas_src>

<mosaic_0001>
module attributes {stable_mosaic.version = 11 : i64} {
  func.func @_convffn_block_kernel(%arg0: i32, %arg1: i32, %arg2: memref<1x4x8x16xf32, #tpu.memory_space<vmem>>, %arg3: memref<4x8x8xf32, #tpu.memory_space<vmem>>, %arg4: memref<4x8xf32, #tpu.memory_space<vmem>>, %arg5: memref<4x8x8xf32, #tpu.memory_space<vmem>>, %arg6: memref<4x8xf32, #tpu.memory_space<vmem>>, %arg7: memref<4x4x8xf32, #tpu.memory_space<vmem>>, %arg8: memref<4x8xf32, #tpu.memory_space<vmem>>, %arg9: memref<4x4x8xf32, #tpu.memory_space<vmem>>, %arg10: memref<4x8xf32, #tpu.memory_space<vmem>>, %arg11: memref<1x4x8x16xf32, #tpu.memory_space<vmem>>) attributes {dimension_semantics = [#tpu.dimension_semantics<parallel>, #tpu.dimension_semantics<parallel>], iteration_bounds = array<i64: 2, 1>, scalar_prefetch = 0 : i64, scratch_operands = 0 : i64, tpu.core_type = #tpu.core_type<tc>, window_params = [{transform_indices = @transform_0, window_bounds = array<i64: 1, 4, 8, 16>}, {pipeline_mode = #tpu.pipeline_mode<synchronous>, transform_indices = @transform_1, window_bounds = array<i64: 4, 8, 8>}, {pipeline_mode = #tpu.pipeline_mode<synchronous>, transform_indices = @transform_2, window_bounds = array<i64: 4, 8>}, {pipeline_mode = #tpu.pipeline_mode<synchronous>, transform_indices = @transform_3, window_bounds = array<i64: 4, 8, 8>}, {pipeline_mode = #tpu.pipeline_mode<synchronous>, transform_indices = @transform_4, window_bounds = array<i64: 4, 8>}, {pipeline_mode = #tpu.pipeline_mode<synchronous>, transform_indices = @transform_5, window_bounds = array<i64: 4, 4, 8>}, {pipeline_mode = #tpu.pipeline_mode<synchronous>, transform_indices = @transform_6, window_bounds = array<i64: 4, 8>}, {pipeline_mode = #tpu.pipeline_mode<synchronous>, transform_indices = @transform_7, window_bounds = array<i64: 4, 4, 8>}, {pipeline_mode = #tpu.pipeline_mode<synchronous>, transform_indices = @transform_8, window_bounds = array<i64: 4, 8>}, {transform_indices = @transform_9, window_bounds = array<i64: 1, 4, 8, 16>}]} {
    %c0 = arith.constant 0 : index
    %c0_0 = arith.constant 0 : index
    %c0_1 = arith.constant 0 : index
    %c0_2 = arith.constant 0 : index
    %0 = vector.load %arg2[%c0, %c0_0, %c0_1, %c0_2] : memref<1x4x8x16xf32, #tpu.memory_space<vmem>>, vector<1x4x8x16xf32>
    %1 = vector.shape_cast %0 : vector<1x4x8x16xf32> to vector<4x8x16xf32>
    %c0_3 = arith.constant 0 : index
    %c0_4 = arith.constant 0 : index
    %c0_5 = arith.constant 0 : index
    %2 = vector.load %arg3[%c0_3, %c0_4, %c0_5] : memref<4x8x8xf32, #tpu.memory_space<vmem>>, vector<4x8x8xf32>
    "tpu.trace_start"() <{level = 10 : i32, message = "dij,djn->din"}> : () -> ()
    %cst = arith.constant dense<0.000000e+00> : vector<4x8x16xf32>
    %3 = tpu.matmul %2, %1, %cst {dimension_numbers = #tpu.dot_dimension_numbers<[2], [1], [1], [2], [0, 0, 0, 1, 1, 2], [0], [0]>} : vector<4x8x8xf32>, vector<4x8x16xf32>, vector<4x8x16xf32> -> vector<4x8x16xf32>
    "tpu.trace_stop"() : () -> ()
    %c0_6 = arith.constant 0 : index
    %c0_7 = arith.constant 0 : index
    %4 = vector.load %arg4[%c0_6, %c0_7] : memref<4x8xf32, #tpu.memory_space<vmem>>, vector<4x8xf32>
    %5 = vector.shape_cast %4 : vector<4x8xf32> to vector<4x8x1xf32>
    %6 = vector.broadcast %5 : vector<4x8x1xf32> to vector<4x8x16xf32>
    %7 = arith.addf %3, %6 : vector<4x8x16xf32>
    %cst_8 = arith.constant 0.707106769 : f32
    %8 = vector.broadcast %cst_8 : f32 to vector<4x8x16xf32>
    %9 = arith.mulf %7, %8 : vector<4x8x16xf32>
    %10 = math.absf %9 : vector<4x8x16xf32>
    %cst_9 = arith.constant 0.327591091 : f32
    %11 = vector.broadcast %cst_9 : f32 to vector<4x8x16xf32>
    %12 = arith.mulf %11, %10 : vector<4x8x16xf32>
    %cst_10 = arith.constant 1.000000e+00 : f32
    %13 = vector.broadcast %cst_10 : f32 to vector<4x8x16xf32>
    %14 = arith.addf %13, %12 : vector<4x8x16xf32>
    %cst_11 = arith.constant 1.000000e+00 : f32
    %15 = vector.broadcast %cst_11 : f32 to vector<4x8x16xf32>
    %16 = arith.divf %15, %14 : vector<4x8x16xf32>
    %cst_12 = arith.constant 1.06140542 : f32
    %17 = vector.broadcast %cst_12 : f32 to vector<4x8x16xf32>
    %18 = arith.mulf %16, %17 : vector<4x8x16xf32>
    %cst_13 = arith.constant -1.45315206 : f32
    %19 = vector.broadcast %cst_13 : f32 to vector<4x8x16xf32>
    %20 = arith.addf %19, %18 : vector<4x8x16xf32>
    %21 = arith.mulf %16, %20 : vector<4x8x16xf32>
    %cst_14 = arith.constant 1.42141378 : f32
    %22 = vector.broadcast %cst_14 : f32 to vector<4x8x16xf32>
    %23 = arith.addf %22, %21 : vector<4x8x16xf32>
    %24 = arith.mulf %16, %23 : vector<4x8x16xf32>
    %cst_15 = arith.constant -0.284496725 : f32
    %25 = vector.broadcast %cst_15 : f32 to vector<4x8x16xf32>
    %26 = arith.addf %25, %24 : vector<4x8x16xf32>
    %27 = arith.mulf %16, %26 : vector<4x8x16xf32>
    %cst_16 = arith.constant 0.254829586 : f32
    %28 = vector.broadcast %cst_16 : f32 to vector<4x8x16xf32>
    %29 = arith.addf %28, %27 : vector<4x8x16xf32>
    %30 = arith.mulf %16, %29 : vector<4x8x16xf32>
    %cst_17 = arith.constant 0.000000e+00 : f32
    %31 = vector.broadcast %cst_17 : f32 to vector<4x8x16xf32>
    %32 = arith.subf %31, %10 : vector<4x8x16xf32>
    %33 = arith.mulf %32, %10 : vector<4x8x16xf32>
    %34 = math.exp %33 : vector<4x8x16xf32>
    %35 = arith.mulf %30, %34 : vector<4x8x16xf32>
    %cst_18 = arith.constant 1.000000e+00 : f32
    %36 = vector.broadcast %cst_18 : f32 to vector<4x8x16xf32>
    %37 = arith.subf %36, %35 : vector<4x8x16xf32>
    %cst_19 = arith.constant 0.000000e+00 : f32
    %38 = vector.broadcast %cst_19 : f32 to vector<4x8x16xf32>
    %39 = arith.cmpf olt, %9, %38 : vector<4x8x16xf32>
    %cst_20 = arith.constant 0.000000e+00 : f32
    %40 = vector.broadcast %cst_20 : f32 to vector<4x8x16xf32>
    %41 = arith.subf %40, %37 : vector<4x8x16xf32>
    %42 = arith.select %39, %41, %37 : vector<4x8x16xi1>, vector<4x8x16xf32>
    %cst_21 = arith.constant 5.000000e-01 : f32
    %43 = vector.broadcast %cst_21 : f32 to vector<4x8x16xf32>
    %44 = arith.mulf %7, %43 : vector<4x8x16xf32>
    %cst_22 = arith.constant 1.000000e+00 : f32
    %45 = vector.broadcast %cst_22 : f32 to vector<4x8x16xf32>
    %46 = arith.addf %45, %42 : vector<4x8x16xf32>
    %47 = arith.mulf %44, %46 : vector<4x8x16xf32>
    %c0_23 = arith.constant 0 : index
    %c0_24 = arith.constant 0 : index
    %c0_25 = arith.constant 0 : index
    %48 = vector.load %arg5[%c0_23, %c0_24, %c0_25] : memref<4x8x8xf32, #tpu.memory_space<vmem>>, vector<4x8x8xf32>
    "tpu.trace_start"() <{level = 10 : i32, message = "dij,djn->din"}> : () -> ()
    %cst_26 = arith.constant dense<0.000000e+00> : vector<4x8x16xf32>
    %49 = tpu.matmul %48, %47, %cst_26 {dimension_numbers = #tpu.dot_dimension_numbers<[2], [1], [1], [2], [0, 0, 0, 1, 1, 2], [0], [0]>} : vector<4x8x8xf32>, vector<4x8x16xf32>, vector<4x8x16xf32> -> vector<4x8x16xf32>
    "tpu.trace_stop"() : () -> ()
    %c0_27 = arith.constant 0 : index
    %c0_28 = arith.constant 0 : index
    %50 = vector.load %arg6[%c0_27, %c0_28] : memref<4x8xf32, #tpu.memory_space<vmem>>, vector<4x8xf32>
    %51 = vector.shape_cast %50 : vector<4x8xf32> to vector<4x8x1xf32>
    %52 = vector.broadcast %51 : vector<4x8x1xf32> to vector<4x8x16xf32>
    %53 = arith.addf %49, %52 : vector<4x8x16xf32>
    %c0_29 = arith.constant 0 : index
    %c0_30 = arith.constant 0 : index
    %c0_31 = arith.constant 0 : index
    %54 = vector.load %arg7[%c0_29, %c0_30, %c0_31] : memref<4x4x8xf32, #tpu.memory_space<vmem>>, vector<1x4x8xf32>
    %55 = vector.shape_cast %54 : vector<1x4x8xf32> to vector<4x8xf32>
    %56 = vector.shape_cast %55 : vector<4x8xf32> to vector<4x8x1xf32>
    %57 = vector.extract_strided_slice %53 {offsets = [0, 0, 0], sizes = [1, 8, 16], strides = [1, 1, 1]} : vector<4x8x16xf32> to vector<1x8x16xf32>
    %58 = vector.shape_cast %57 : vector<1x8x16xf32> to vector<8x16xf32>
    %59 = vector.shape_cast %58 : vector<8x16xf32> to vector<1x8x16xf32>
    %60 = vector.broadcast %56 : vector<4x8x1xf32> to vector<4x8x16xf32>
    %61 = vector.broadcast %59 : vector<1x8x16xf32> to vector<4x8x16xf32>
    %62 = arith.mulf %60, %61 : vector<4x8x16xf32>
    %c1 = arith.constant 1 : index
    %c0_32 = arith.constant 0 : index
    %c0_33 = arith.constant 0 : index
    %63 = vector.load %arg7[%c1, %c0_32, %c0_33] : memref<4x4x8xf32, #tpu.memory_space<vmem>>, vector<1x4x8xf32>
    %64 = vector.shape_cast %63 : vector<1x4x8xf32> to vector<4x8xf32>
    %65 = vector.shape_cast %64 : vector<4x8xf32> to vector<4x8x1xf32>
    %66 = vector.extract_strided_slice %53 {offsets = [1, 0, 0], sizes = [1, 8, 16], strides = [1, 1, 1]} : vector<4x8x16xf32> to vector<1x8x16xf32>
    %67 = vector.shape_cast %66 : vector<1x8x16xf32> to vector<8x16xf32>
    %68 = vector.shape_cast %67 : vector<8x16xf32> to vector<1x8x16xf32>
    %69 = vector.broadcast %65 : vector<4x8x1xf32> to vector<4x8x16xf32>
    %70 = vector.broadcast %68 : vector<1x8x16xf32> to vector<4x8x16xf32>
    %71 = arith.mulf %69, %70 : vector<4x8x16xf32>
    %72 = arith.addf %62, %71 : vector<4x8x16xf32>
    %c2 = arith.constant 2 : index
    %c0_34 = arith.constant 0 : index
    %c0_35 = arith.constant 0 : index
    %73 = vector.load %arg7[%c2, %c0_34, %c0_35] : memref<4x4x8xf32, #tpu.memory_space<vmem>>, vector<1x4x8xf32>
    %74 = vector.shape_cast %73 : vector<1x4x8xf32> to vector<4x8xf32>
    %75 = vector.shape_cast %74 : vector<4x8xf32> to vector<4x8x1xf32>
    %76 = vector.extract_strided_slice %53 {offsets = [2, 0, 0], sizes = [1, 8, 16], strides = [1, 1, 1]} : vector<4x8x16xf32> to vector<1x8x16xf32>
    %77 = vector.shape_cast %76 : vector<1x8x16xf32> to vector<8x16xf32>
    %78 = vector.shape_cast %77 : vector<8x16xf32> to vector<1x8x16xf32>
    %79 = vector.broadcast %75 : vector<4x8x1xf32> to vector<4x8x16xf32>
    %80 = vector.broadcast %78 : vector<1x8x16xf32> to vector<4x8x16xf32>
    %81 = arith.mulf %79, %80 : vector<4x8x16xf32>
    %82 = arith.addf %72, %81 : vector<4x8x16xf32>
    %c3 = arith.constant 3 : index
    %c0_36 = arith.constant 0 : index
    %c0_37 = arith.constant 0 : index
    %83 = vector.load %arg7[%c3, %c0_36, %c0_37] : memref<4x4x8xf32, #tpu.memory_space<vmem>>, vector<1x4x8xf32>
    %84 = vector.shape_cast %83 : vector<1x4x8xf32> to vector<4x8xf32>
    %85 = vector.shape_cast %84 : vector<4x8xf32> to vector<4x8x1xf32>
    %86 = vector.extract_strided_slice %53 {offsets = [3, 0, 0], sizes = [1, 8, 16], strides = [1, 1, 1]} : vector<4x8x16xf32> to vector<1x8x16xf32>
    %87 = vector.shape_cast %86 : vector<1x8x16xf32> to vector<8x16xf32>
    %88 = vector.shape_cast %87 : vector<8x16xf32> to vector<1x8x16xf32>
    %89 = vector.broadcast %85 : vector<4x8x1xf32> to vector<4x8x16xf32>
    %90 = vector.broadcast %88 : vector<1x8x16xf32> to vector<4x8x16xf32>
    %91 = arith.mulf %89, %90 : vector<4x8x16xf32>
    %92 = arith.addf %82, %91 : vector<4x8x16xf32>
    %c0_38 = arith.constant 0 : index
    %c0_39 = arith.constant 0 : index
    %93 = vector.load %arg8[%c0_38, %c0_39] : memref<4x8xf32, #tpu.memory_space<vmem>>, vector<4x8xf32>
    %94 = vector.shape_cast %93 : vector<4x8xf32> to vector<4x8x1xf32>
    %95 = vector.broadcast %94 : vector<4x8x1xf32> to vector<4x8x16xf32>
    %96 = arith.addf %92, %95 : vector<4x8x16xf32>
    %cst_40 = arith.constant 0.707106769 : f32
    %97 = vector.broadcast %cst_40 : f32 to vector<4x8x16xf32>
    %98 = arith.mulf %96, %97 : vector<4x8x16xf32>
    %99 = math.absf %98 : vector<4x8x16xf32>
    %cst_41 = arith.constant 0.327591091 : f32
    %100 = vector.broadcast %cst_41 : f32 to vector<4x8x16xf32>
    %101 = arith.mulf %100, %99 : vector<4x8x16xf32>
    %cst_42 = arith.constant 1.000000e+00 : f32
    %102 = vector.broadcast %cst_42 : f32 to vector<4x8x16xf32>
    %103 = arith.addf %102, %101 : vector<4x8x16xf32>
    %cst_43 = arith.constant 1.000000e+00 : f32
    %104 = vector.broadcast %cst_43 : f32 to vector<4x8x16xf32>
    %105 = arith.divf %104, %103 : vector<4x8x16xf32>
    %cst_44 = arith.constant 1.06140542 : f32
    %106 = vector.broadcast %cst_44 : f32 to vector<4x8x16xf32>
    %107 = arith.mulf %105, %106 : vector<4x8x16xf32>
    %cst_45 = arith.constant -1.45315206 : f32
    %108 = vector.broadcast %cst_45 : f32 to vector<4x8x16xf32>
    %109 = arith.addf %108, %107 : vector<4x8x16xf32>
    %110 = arith.mulf %105, %109 : vector<4x8x16xf32>
    %cst_46 = arith.constant 1.42141378 : f32
    %111 = vector.broadcast %cst_46 : f32 to vector<4x8x16xf32>
    %112 = arith.addf %111, %110 : vector<4x8x16xf32>
    %113 = arith.mulf %105, %112 : vector<4x8x16xf32>
    %cst_47 = arith.constant -0.284496725 : f32
    %114 = vector.broadcast %cst_47 : f32 to vector<4x8x16xf32>
    %115 = arith.addf %114, %113 : vector<4x8x16xf32>
    %116 = arith.mulf %105, %115 : vector<4x8x16xf32>
    %cst_48 = arith.constant 0.254829586 : f32
    %117 = vector.broadcast %cst_48 : f32 to vector<4x8x16xf32>
    %118 = arith.addf %117, %116 : vector<4x8x16xf32>
    %119 = arith.mulf %105, %118 : vector<4x8x16xf32>
    %cst_49 = arith.constant 0.000000e+00 : f32
    %120 = vector.broadcast %cst_49 : f32 to vector<4x8x16xf32>
    %121 = arith.subf %120, %99 : vector<4x8x16xf32>
    %122 = arith.mulf %121, %99 : vector<4x8x16xf32>
    %123 = math.exp %122 : vector<4x8x16xf32>
    %124 = arith.mulf %119, %123 : vector<4x8x16xf32>
    %cst_50 = arith.constant 1.000000e+00 : f32
    %125 = vector.broadcast %cst_50 : f32 to vector<4x8x16xf32>
    %126 = arith.subf %125, %124 : vector<4x8x16xf32>
    %cst_51 = arith.constant 0.000000e+00 : f32
    %127 = vector.broadcast %cst_51 : f32 to vector<4x8x16xf32>
    %128 = arith.cmpf olt, %98, %127 : vector<4x8x16xf32>
    %cst_52 = arith.constant 0.000000e+00 : f32
    %129 = vector.broadcast %cst_52 : f32 to vector<4x8x16xf32>
    %130 = arith.subf %129, %126 : vector<4x8x16xf32>
    %131 = arith.select %128, %130, %126 : vector<4x8x16xi1>, vector<4x8x16xf32>
    %cst_53 = arith.constant 5.000000e-01 : f32
    %132 = vector.broadcast %cst_53 : f32 to vector<4x8x16xf32>
    %133 = arith.mulf %96, %132 : vector<4x8x16xf32>
    %cst_54 = arith.constant 1.000000e+00 : f32
    %134 = vector.broadcast %cst_54 : f32 to vector<4x8x16xf32>
    %135 = arith.addf %134, %131 : vector<4x8x16xf32>
    %136 = arith.mulf %133, %135 : vector<4x8x16xf32>
    %c0_55 = arith.constant 0 : index
    %c0_56 = arith.constant 0 : index
    %c0_57 = arith.constant 0 : index
    %137 = vector.load %arg9[%c0_55, %c0_56, %c0_57] : memref<4x4x8xf32, #tpu.memory_space<vmem>>, vector<1x4x8xf32>
    %138 = vector.shape_cast %137 : vector<1x4x8xf32> to vector<4x8xf32>
    %139 = vector.shape_cast %138 : vector<4x8xf32> to vector<4x8x1xf32>
    %140 = vector.extract_strided_slice %136 {offsets = [0, 0, 0], sizes = [1, 8, 16], strides = [1, 1, 1]} : vector<4x8x16xf32> to vector<1x8x16xf32>
    %141 = vector.shape_cast %140 : vector<1x8x16xf32> to vector<8x16xf32>
    %142 = vector.shape_cast %141 : vector<8x16xf32> to vector<1x8x16xf32>
    %143 = vector.broadcast %139 : vector<4x8x1xf32> to vector<4x8x16xf32>
    %144 = vector.broadcast %142 : vector<1x8x16xf32> to vector<4x8x16xf32>
    %145 = arith.mulf %143, %144 : vector<4x8x16xf32>
    %c1_58 = arith.constant 1 : index
    %c0_59 = arith.constant 0 : index
    %c0_60 = arith.constant 0 : index
    %146 = vector.load %arg9[%c1_58, %c0_59, %c0_60] : memref<4x4x8xf32, #tpu.memory_space<vmem>>, vector<1x4x8xf32>
    %147 = vector.shape_cast %146 : vector<1x4x8xf32> to vector<4x8xf32>
    %148 = vector.shape_cast %147 : vector<4x8xf32> to vector<4x8x1xf32>
    %149 = vector.extract_strided_slice %136 {offsets = [1, 0, 0], sizes = [1, 8, 16], strides = [1, 1, 1]} : vector<4x8x16xf32> to vector<1x8x16xf32>
    %150 = vector.shape_cast %149 : vector<1x8x16xf32> to vector<8x16xf32>
    %151 = vector.shape_cast %150 : vector<8x16xf32> to vector<1x8x16xf32>
    %152 = vector.broadcast %148 : vector<4x8x1xf32> to vector<4x8x16xf32>
    %153 = vector.broadcast %151 : vector<1x8x16xf32> to vector<4x8x16xf32>
    %154 = arith.mulf %152, %153 : vector<4x8x16xf32>
    %155 = arith.addf %145, %154 : vector<4x8x16xf32>
    %c2_61 = arith.constant 2 : index
    %c0_62 = arith.constant 0 : index
    %c0_63 = arith.constant 0 : index
    %156 = vector.load %arg9[%c2_61, %c0_62, %c0_63] : memref<4x4x8xf32, #tpu.memory_space<vmem>>, vector<1x4x8xf32>
    %157 = vector.shape_cast %156 : vector<1x4x8xf32> to vector<4x8xf32>
    %158 = vector.shape_cast %157 : vector<4x8xf32> to vector<4x8x1xf32>
    %159 = vector.extract_strided_slice %136 {offsets = [2, 0, 0], sizes = [1, 8, 16], strides = [1, 1, 1]} : vector<4x8x16xf32> to vector<1x8x16xf32>
    %160 = vector.shape_cast %159 : vector<1x8x16xf32> to vector<8x16xf32>
    %161 = vector.shape_cast %160 : vector<8x16xf32> to vector<1x8x16xf32>
    %162 = vector.broadcast %158 : vector<4x8x1xf32> to vector<4x8x16xf32>
    %163 = vector.broadcast %161 : vector<1x8x16xf32> to vector<4x8x16xf32>
    %164 = arith.mulf %162, %163 : vector<4x8x16xf32>
    %165 = arith.addf %155, %164 : vector<4x8x16xf32>
    %c3_64 = arith.constant 3 : index
    %c0_65 = arith.constant 0 : index
    %c0_66 = arith.constant 0 : index
    %166 = vector.load %arg9[%c3_64, %c0_65, %c0_66] : memref<4x4x8xf32, #tpu.memory_space<vmem>>, vector<1x4x8xf32>
    %167 = vector.shape_cast %166 : vector<1x4x8xf32> to vector<4x8xf32>
    %168 = vector.shape_cast %167 : vector<4x8xf32> to vector<4x8x1xf32>
    %169 = vector.extract_strided_slice %136 {offsets = [3, 0, 0], sizes = [1, 8, 16], strides = [1, 1, 1]} : vector<4x8x16xf32> to vector<1x8x16xf32>
    %170 = vector.shape_cast %169 : vector<1x8x16xf32> to vector<8x16xf32>
    %171 = vector.shape_cast %170 : vector<8x16xf32> to vector<1x8x16xf32>
    %172 = vector.broadcast %168 : vector<4x8x1xf32> to vector<4x8x16xf32>
    %173 = vector.broadcast %171 : vector<1x8x16xf32> to vector<4x8x16xf32>
    %174 = arith.mulf %172, %173 : vector<4x8x16xf32>
    %175 = arith.addf %165, %174 : vector<4x8x16xf32>
    %c0_67 = arith.constant 0 : index
    %c0_68 = arith.constant 0 : index
    %176 = vector.load %arg10[%c0_67, %c0_68] : memref<4x8xf32, #tpu.memory_space<vmem>>, vector<4x8xf32>
    %177 = vector.shape_cast %176 : vector<4x8xf32> to vector<4x8x1xf32>
    %178 = vector.broadcast %177 : vector<4x8x1xf32> to vector<4x8x16xf32>
    %179 = arith.addf %175, %178 : vector<4x8x16xf32>
    %180 = arith.addf %1, %179 : vector<4x8x16xf32>
    %c0_69 = arith.constant 0 : index
    %c0_70 = arith.constant 0 : index
    %c0_71 = arith.constant 0 : index
    %c0_72 = arith.constant 0 : index
    %181 = vector.load %arg11[%c0_69, %c0_70, %c0_71, %c0_72] : memref<1x4x8x16xf32, #tpu.memory_space<vmem>>, vector<1x4x8x16xf32>
    %182 = vector.shape_cast %181 : vector<1x4x8x16xf32> to vector<4x8x16xf32>
    %183 = vector.shape_cast %180 : vector<4x8x16xf32> to vector<1x4x8x16xf32>
    tpu.vector_store %arg11[%c0_69, %c0_70, %c0_71, %c0_72], %183 {strides = array<i32>} : memref<1x4x8x16xf32, #tpu.memory_space<vmem>>, vector<1x4x8x16xf32>,
    return
  }
  func.func @transform_0(%arg0: i32, %arg1: i32) -> (i32, i32, i32, i32) {
    %c0_i32 = arith.constant 0 : i32
    %c0_i32_0 = arith.constant 0 : i32
    %c0_i32_1 = arith.constant 0 : i32
    return %arg0, %c0_i32, %c0_i32_0, %arg1 : i32, i32, i32, i32
  }
  func.func @transform_1(%arg0: i32, %arg1: i32) -> (i32, i32, i32) {
    %c0_i32 = arith.constant 0 : i32
    %c0_i32_0 = arith.constant 0 : i32
    %c0_i32_1 = arith.constant 0 : i32
    %c0_i32_2 = arith.constant 0 : i32
    return %c0_i32, %c0_i32_0, %c0_i32_1 : i32, i32, i32
  }
  func.func @transform_2(%arg0: i32, %arg1: i32) -> (i32, i32) {
    %c0_i32 = arith.constant 0 : i32
    %c0_i32_0 = arith.constant 0 : i32
    %c0_i32_1 = arith.constant 0 : i32
    return %c0_i32, %c0_i32_0 : i32, i32
  }
  func.func @transform_3(%arg0: i32, %arg1: i32) -> (i32, i32, i32) {
    %c0_i32 = arith.constant 0 : i32
    %c0_i32_0 = arith.constant 0 : i32
    %c0_i32_1 = arith.constant 0 : i32
    %c0_i32_2 = arith.constant 0 : i32
    return %c0_i32, %c0_i32_0, %c0_i32_1 : i32, i32, i32
  }
  func.func @transform_4(%arg0: i32, %arg1: i32) -> (i32, i32) {
    %c0_i32 = arith.constant 0 : i32
    %c0_i32_0 = arith.constant 0 : i32
    %c0_i32_1 = arith.constant 0 : i32
    return %c0_i32, %c0_i32_0 : i32, i32
  }
  func.func @transform_5(%arg0: i32, %arg1: i32) -> (i32, i32, i32) {
    %c0_i32 = arith.constant 0 : i32
    %c0_i32_0 = arith.constant 0 : i32
    %c0_i32_1 = arith.constant 0 : i32
    %c0_i32_2 = arith.constant 0 : i32
    return %c0_i32, %c0_i32_0, %c0_i32_1 : i32, i32, i32
  }
  func.func @transform_6(%arg0: i32, %arg1: i32) -> (i32, i32) {
    %c0_i32 = arith.constant 0 : i32
    %c0_i32_0 = arith.constant 0 : i32
    %c0_i32_1 = arith.constant 0 : i32
    return %c0_i32, %c0_i32_0 : i32, i32
  }
  func.func @transform_7(%arg0: i32, %arg1: i32) -> (i32, i32, i32) {
    %c0_i32 = arith.constant 0 : i32
    %c0_i32_0 = arith.constant 0 : i32
    %c0_i32_1 = arith.constant 0 : i32
    %c0_i32_2 = arith.constant 0 : i32
    return %c0_i32, %c0_i32_0, %c0_i32_1 : i32, i32, i32
  }
  func.func @transform_8(%arg0: i32, %arg1: i32) -> (i32, i32) {
    %c0_i32 = arith.constant 0 : i32
    %c0_i32_0 = arith.constant 0 : i32
    %c0_i32_1 = arith.constant 0 : i32
    return %c0_i32, %c0_i32_0 : i32, i32
  }
  func.func @transform_9(%arg0: i32, %arg1: i32) -> (i32, i32, i32, i32) {
    %c0_i32 = arith.constant 0 : i32
    %c0_i32_0 = arith.constant 0 : i32
    %c0_i32_1 = arith.constant 0 : i32
    return %arg0, %c0_i32, %c0_i32_0, %arg1 : i32, i32, i32, i32
  }
}

</mosaic_0001>

<bundles_post_ra>
// kernel: tpu_custom_call.1
= control target key start
LH: loop header
LB: loop body
LE: loop exit
PB: predicated region body
PF: predicated region fallthrough
CT: control target
= control target key end

     0   :  { %s2960_s0 = inlined_call_operand.hbm [shape: f32[2,4,8,16], index: 0, kind: input, shape index: {}]   ;;  %s2961_s1 = inlined_call_operand.hbm [shape: f32[4,8,8], index: 1, kind: input, shape index: {}]   ;;  %s2962_s2 = inlined_call_operand.hbm [shape: f32[4,8], index: 2, kind: input, shape index: {}]   ;;  %s2963_s3 = inlined_call_operand.hbm [shape: f32[4,8,8], index: 3, kind: input, shape index: {}]   ;;  %s2964_s4 = inlined_call_operand.hbm [shape: f32[4,8], index: 4, kind: input, shape index: {}]   ;;  %s2965_s5 = inlined_call_operand.vmem [shape: f32[4,4,8], index: 5, kind: input, shape index: {}]   ;;  %s2966_s6 = inlined_call_operand.vmem [shape: f32[4,8], index: 6, kind: input, shape index: {}]   ;;  %s2967_s7 = inlined_call_operand.hbm [shape: f32[4,4,8], index: 7, kind: input, shape index: {}]   ;;  %s2968_s8 = inlined_call_operand.vmem [shape: f32[4,8], index: 8, kind: input, shape index: {}]   ;;  %s2969_s9 = inlined_call_operand.hbm [shape: f32[2,4,8,16], index: 9, kind: output, shape index: {}]  }
   0x1   :  { %2978 = sst [smem:[#allocation20_spill]] %s2968_s8 }
   0x2   :  { %2979 = sst [smem:[#allocation21_spill]] %s2969_s9 }
   0x3   :  { %14 = vsyncpa [#allocation3], 0 }
   0x4   :  { %16 = vsyncpa [#allocation3 + $0x1], 0 }
   0x5   :  { %17 = vsyncpa [#allocation6], 0 }
   0x6   :  { %18 = vsyncpa [#allocation9], 0 }
   0x7   :  { %19 = vsyncpa [#allocation12], 0 }
   0x8   :  { %20 = vsyncpa [#allocation4], 0 }
   0x9   :  { %22 = vsyncpa [#allocation4 + $0x1], 0  ;;  %s2406_s30 = smov 0   ;;  %s2408_s10 = smov 0  }
   0xa   :  { %s2410_s11 = smov 0   ;;  %s2412_s12 = smov 0  }
   0xb   :  { %s2414_s13 = smov 0   ;;  %s2416_s14 = smov 0  }
   0xc LB: > { %2980 = sst [smem:[#allocation19_spill]] %s2331_s12  ;;  %s2970_s15 = sadd.s32 4294967295, %s2339_s14   ;;  %s2339_s14 = sphi %s2416_s14, %s28_s14   ;;  %s2335_s13 = sphi %s2414_s13, %s3006_s13   ;;  %s2331_s12 = sphi %s2412_s12, %s3005_s12   ;;  %s2327_s11 = sphi %s2410_s11, %s3004_s11   ;;  %s2323_s10 = sphi %s2408_s10, %s3003_s10   ;;  %s2319_s30 = sphi %s2406_s30, %s3002_s30  }
   0xd   : > { %p1827_p0 = scmp.ge.s32.totalorder %s2339_s14, 1  ;;  %p2440_p1 = scmp.eq.s32.totalorder %s2970_s15, 0 }
   0xe   : > { %p269_p2 = scmp.lt.s32.totalorder %s2339_s14, 3  ;;  %s2341_s18 = smov [#allocation5]  }
   0xf   : > { %s2981_s16 = scalar_select %p2440_p1, 1, 0 }
  0x10   : > { %p2445_p3 = pnand %p1827_p0, %p269_p2  ;;  %s281_s19 = sshll.u32 %s2341_s18, 4  ;;  %s2449_s19 = int_to_ptr.vmem [resolvable:$true] %s281_s19 }
  0x11   : > { %s2342_s21 = smov [#allocation8]   ;;  %s2343_s23 = smov [#allocation7]  }
  0x12   : > { %s2982_s17 = scalar_select %p2445_p3, 1, 0 }
  0x13   : > { %p1943_p4 = pneg %p2445_p3  ;;  %s305_s22 = sshll.u32 %s2342_s21, 4  ;;  %s2460_s22 = int_to_ptr.vmem [resolvable:$true] %s305_s22 }
  0x14   : > { %s2462_s24 = sshll.u32 %s2343_s23, 4  ;;  %s2075_s27 = scalar_lea.hbm %s2961_s1, 512  ;;  %s296_s24 = int_to_ptr.vmem [resolvable:$true] %s2462_s24 }
  0x15   : > { %p2456_p6 = pnand %p1943_p4, %p2440_p1  ;;  %p2076_p7 = scmp.ne.s32.totalorder %s2961_s1, %s2075_s27 }
  0x16   : > { %p2082_p11 = scmp.lt.u32.totalorder %s2075_s27, %s2961_s1 }
  0x17   : > { %p2472_p8 = pneg %p2456_p6 }
  0x19   : > { %p2078_p9 = pnand %p2472_p8, %p2076_p7 }
  0x1b   : > { %p2079_p10 = pneg %p2078_p9 }
  0x1d   : > { %p2084_p12 = pnand %p2082_p11, %p2079_p10 }
  0x1f   : > { %2087 = shalt.err (!%p2084_p12)
}
  0x20   : > { %s2088_s25 = scalar_lea.vmem %s2449_s19, 512  ;;  %p2096_p4 = scmp.lt.s32.totalorder %s2449_s19, %s2449_s19 }
  0x21   : > { %p2089_p13 = scmp.ne.s32.totalorder %s2449_s19, %s2088_s25  ;;  %p2097_p5 = scmp.lt.s32.totalorder %s2088_s25, %s2088_s25 }
  0x23   : > { %p2091_p0 = pnand %p2089_p13, %p2472_p8  ;;  %p2098_p7 = por %p2097_p5, %p2096_p4 }
  0x25   : > { %p2092_p2 = pneg %p2091_p0 }
  0x27   : > { %p2099_p9 = pnand %p2098_p7, %p2092_p2 }
  0x29   : > { %2102 = shalt.err (!%p2099_p9)
}
  0x2a   : > { %s2975_s26 = smov 128   ;;  %s2976_s27 = smov 8  }
  0x2b   : > { %1946 = dma.hbm_to_vmem [thread:$0]  (!%p2456_p6), %s2961_s1, 512, %s2449_s19, [#allocation6], %s2975_s26, %s2975_s26, %s2976_s27  }
  0x2c   : > { %s2103_s25 = scalar_lea.hbm %s2963_s3, 512 }
  0x2d   : > { %p2104_p5 = scmp.ne.s32.totalorder %s2963_s3, %s2103_s25  ;;  %p2110_p12 = scmp.lt.u32.totalorder %s2103_s25, %s2963_s3 }
  0x2f   : > { %p2106_p10 = pnand %p2104_p5, %p2472_p8 }
  0x31   : > { %p2107_p11 = pneg %p2106_p10 }
  0x33   : > { %p2112_p13 = pnand %p2110_p12, %p2107_p11 }
  0x35   : > { %2115 = shalt.err (!%p2112_p13)
}
  0x36   : > { %s2116_s19 = scalar_lea.vmem %s2460_s22, 512  ;;  %p2124_p7 = scmp.lt.s32.totalorder %s2460_s22, %s2460_s22 }
  0x37   : > { %p2117_p0 = scmp.ne.s32.totalorder %s2460_s22, %s2116_s19  ;;  %p2125_p9 = scmp.lt.s32.totalorder %s2116_s19, %s2116_s19 }
  0x39   : > { %p2119_p2 = pnand %p2117_p0, %p2472_p8  ;;  %p2126_p5 = por %p2125_p9, %p2124_p7 }
  0x3b   : > { %p2120_p4 = pneg %p2119_p2 }
  0x3d   : > { %p2127_p10 = pnand %p2126_p5, %p2120_p4 }
  0x3f   : > { %2130 = shalt.err (!%p2127_p10)
}
  0x40   : > { %1952 = dma.hbm_to_vmem [thread:$0]  (!%p2456_p6), %s2963_s3, 512, %s2460_s22, [#allocation9], %s2975_s26, %s2975_s26, %s2976_s27  }
  0x41   : > { %s2131_s28 = scalar_lea.hbm %s2962_s2, 64 }
  0x42   : > { %p2132_p11 = scmp.ne.s32.totalorder %s2962_s2, %s2131_s28  ;;  %p2138_p0 = scmp.lt.u32.totalorder %s2131_s28, %s2962_s2 }
  0x44   : > { %p2134_p12 = pnand %p2132_p11, %p2472_p8 }
  0x46   : > { %p2135_p13 = pneg %p2134_p12 }
  0x48   : > { %p2140_p2 = pnand %p2138_p0, %p2135_p13 }
  0x4a   : > { %2143 = shalt.err (!%p2140_p2)
}
  0x4b   : > { %s2144_s19 = scalar_lea.vmem %s296_s24, 64  ;;  %p2152_p5 = scmp.lt.s32.totalorder %s296_s24, %s296_s24 }
  0x4c   : > { %p2145_p4 = scmp.ne.s32.totalorder %s296_s24, %s2144_s19  ;;  %p2153_p10 = scmp.lt.s32.totalorder %s2144_s19, %s2144_s19 }
  0x4e   : > { %p2147_p7 = pnand %p2145_p4, %p2472_p8  ;;  %p2154_p3 = por %p2153_p10, %p2152_p5 }
  0x50   : > { %p2148_p9 = pneg %p2147_p7 }
  0x52   : > { %p2155_p1 = pnand %p2154_p3, %p2148_p9 }
  0x54   : > { %2158 = shalt.err (!%p2155_p1)
}
  0x55   : > { %1949 = dma.hbm_to_vmem [thread:$0]  (!%p2456_p6), %s2962_s2, 64, %s296_s24, [#allocation6]  }
  0x56   : > { %s2346_s9 = smov [#allocation10]   ;;  %s2347_s15 = smov [#allocation11]  }
  0x57   : > { %s319_s12 = sshll.u32 %s2346_s9, 4  ;;  %s335_s28 = sshll.u32 %s2347_s15, 4  ;;  %s320_s12 = int_to_ptr.vmem [resolvable:$true] %s319_s12  ;;  %s336_s28 = int_to_ptr.vmem [resolvable:$true] %s335_s28 }
  0x58   : > { %s2159_s23 = scalar_lea.hbm %s2964_s4, 64 }
  0x59   : > { %p2160_p1 = scmp.ne.s32.totalorder %s2964_s4, %s2159_s23  ;;  %p2166_p12 = scmp.lt.u32.totalorder %s2159_s23, %s2964_s4 }
  0x5b   : > { %p2162_p3 = pnand %p2160_p1, %p2472_p8 }
  0x5d   : > { %p2163_p11 = pneg %p2162_p3 }
  0x5f   : > { %p2168_p13 = pnand %p2166_p12, %p2163_p11 }
  0x61   : > { %2171 = shalt.err (!%p2168_p13)
}
  0x62   : > { %s2172_s24 = scalar_lea.vmem %s320_s12, 64  ;;  %p2180_p7 = scmp.lt.s32.totalorder %s320_s12, %s320_s12 }
  0x63   : > { %p2173_p0 = scmp.ne.s32.totalorder %s320_s12, %s2172_s24  ;;  %p2181_p9 = scmp.lt.s32.totalorder %s2172_s24, %s2172_s24 }
  0x65   : > { %p2175_p2 = pnand %p2173_p0, %p2472_p8  ;;  %p2182_p5 = por %p2181_p9, %p2180_p7 }
  0x67   : > { %p2176_p4 = pneg %p2175_p2 }
  0x69   : > { %p2183_p10 = pnand %p2182_p5, %p2176_p4 }
  0x6b   : > { %2186 = shalt.err (!%p2183_p10)
}
  0x6c   : > { %1955 = dma.hbm_to_vmem [thread:$0]  (!%p2456_p6), %s2964_s4, 64, %s320_s12, [#allocation9]  }
  0x6d   : > { %s2187_s29 = scalar_lea.hbm %s2967_s7, 256 }
  0x6e   : > { %p2188_p1 = scmp.ne.s32.totalorder %s2967_s7, %s2187_s29  ;;  %p2194_p12 = scmp.lt.u32.totalorder %s2187_s29, %s2967_s7 }
  0x70   : > { %p2190_p3 = pnand %p2188_p1, %p2472_p8 }
  0x72   : > { %p2191_p11 = pneg %p2190_p3 }
  0x74   : > { %p2196_p13 = pnand %p2194_p12, %p2191_p11 }
  0x76   : > { %2199 = shalt.err (!%p2196_p13)
}
  0x77   : > { %s2200_s22 = scalar_lea.vmem %s336_s28, 256  ;;  %p2208_p7 = scmp.lt.s32.totalorder %s336_s28, %s336_s28 }
  0x78   : > { %p2201_p0 = scmp.ne.s32.totalorder %s336_s28, %s2200_s22  ;;  %p2209_p9 = scmp.lt.s32.totalorder %s2200_s22, %s2200_s22 }
  0x7a   : > { %p2203_p2 = pnand %p2201_p0, %p2472_p8  ;;  %p2210_p5 = por %p2209_p9, %p2208_p7 }
  0x7c   : > { %p2204_p4 = pneg %p2203_p2 }
  0x7e   : > { %p2211_p10 = pnand %p2210_p5, %p2204_p4 }
  0x80   : > { %2214 = shalt.err (!%p2211_p10)
}
  0x81   : > { %s2348_s12 = smov 64   ;;  %s2349_s18 = smov 4  }
  0x82   : > { %1958 = dma.hbm_to_vmem [thread:$0]  (!%p2456_p6), %s2967_s7, 256, %s336_s28, [#allocation12], %s2348_s12, %s2348_s12, %s2349_s18  }
  0x83   : > { %s1826_s9 = sadd.s32 4294967294, %s2339_s14   ;;  %s40_s26 = sadd.s32 1, %s2335_s13 }
  0x84   : > { %s49_s15 = sadd.s32 1, %s2327_s11  ;;  %p42_p8 = scmp.ge.s32.totalorder %s40_s26, 2 }
  0x85   : > { %p56_p1 = scmp.ne.s32.totalorder %s2327_s11, %s2323_s10  ;;  %p57_p3 = scmp.eq.s32.totalorder %s2339_s14, 0 }
  0x86   : > { %p62_p11 = scmp.ne.s32.totalorder %s2323_s10, %s2319_s30  ;;  %s3008_s26 = smov (%p42_p8, %s40_s26), 0 }
  0x87   : > { %p2587_p12 = por %p57_p3, %p56_p1  ;;  %p2986_p13 = scmp.ne.s32.totalorder %s2981_s16, 0 }
  0x88   : > { %s44_s29 = ssub.s32 %s2335_s13, %s3008_s26  ;;  %s2988_s21 = sadd.s32 4294967295, %s2339_s14  }
  0x89   : > { %p2593_p6 = por %p2986_p13, %p62_p11  ;;  %p256_p0 = scmp.eq.s32.totalorder %s2988_s21, 1 }
  0x8a   : > { %p47_p2 = scmp.eq.s32.totalorder %s44_s29, 0  ;;  %p262_p4 = scmp.eq.s32.totalorder %s1826_s9, 1 }
  0x8b   : > { %p2601_p7 = por %p256_p0, %p56_p1  ;;  %p1972_p9 = scmp.lt.s32.totalorder %s2339_s14, 2 }
  0x8c   : > { %s2607_s25 = scalar_select %p47_p2, %s2327_s11, %s49_s15  }
  0x8d   : > { %s2989_s23 = scalar_select %p2601_p7, 1, 0 }
  0x8e   : > { %p2609_p5 = por %p262_p4, %p62_p11  ;;  %s352_s22 = sand.u32 1, %s2327_s11  }
  0x8f   : > { %s1834_s12 = sshll.u32 %s352_s22, 5  ;;  %s1861_s18 = sshll.u32 %s2335_s13, 9 }
  0x90   : > { %s2990_s19 = scalar_select %p2609_p5, 1, 0 }
  0x91   : > { %s2618_s21 = scalar_lea.hbm %s2960_s0, %s1861_s18  ;;  %s356_s9 = scalar_lea.vmem [#allocation2], %s1834_s12 }
  0x92   : > { %s364_s29 = sshll.u32 %s356_s9, 4  ;;  %p2624_p10 = pnand %p1972_p9, %p2587_p12  ;;  %s2620_s29 = int_to_ptr.vmem [resolvable:$true] %s364_s29 }
  0x93   : > { %s2628_s27 = scalar_lea.sflag [#allocation3], %s352_s22  ;;  %s2215_s24 = scalar_lea.hbm %s2618_s21, 512 }
  0x94   : > { %p2216_p8 = scmp.ne.s32.totalorder %s2618_s21, %s2215_s24  ;;  %p2217_p1 = pneg %p2624_p10 }
  0x95   : > { %s2220_s20 = scalar_lea.hbm %s2960_s0, 1024  ;;  %p2221_p12 = scmp.lt.u32.totalorder %s2618_s21, %s2960_s0 }
  0x96   : > { %p2218_p3 = pnand %p2217_p1, %p2216_p8  ;;  %p2222_p13 = scmp.lt.u32.totalorder %s2220_s20, %s2215_s24 }
  0x97   : > { %p2224_p2 = scmp.lt.u32.totalorder %s2215_s24, %s2618_s21 }
  0x98   : > { %p2219_p11 = pneg %p2218_p3  ;;  %p2223_p0 = por %p2222_p13, %p2221_p12 }
  0x9a   : > { %p2225_p4 = por %p2224_p2, %p2223_p0 }
  0x9c   : > { %p2226_p9 = pnand %p2225_p4, %p2219_p11 }
  0x9e   : > { %2229 = shalt.err (!%p2226_p9)
}
  0x9f   : > { %s2230_s22 = scalar_lea.vmem %s2620_s29, 512  ;;  %s2350_s12 = smov [#allocation2]  }
  0xa0   : > { %p2231_p8 = scmp.ne.s32.totalorder %s2620_s29, %s2230_s22  ;;  %s2235_s18 = sshll.u32 %s2350_s12, 4  ;;  %s2236_s18 = int_to_ptr.vmem [resolvable:$false] %s2235_s18 }
  0xa1   : > { %s2237_s8 = scalar_lea.vmem %s2236_s18, 1024  ;;  %p2238_p7 = scmp.lt.s32.totalorder %s2620_s29, %s2236_s18 }
  0xa2   : > { %p2233_p3 = pnand %p2231_p8, %p2217_p1  ;;  %p2239_p12 = scmp.lt.s32.totalorder %s2237_s8, %s2230_s22 }
  0xa4   : > { %p2234_p5 = pneg %p2233_p3  ;;  %p2240_p13 = por %p2239_p12, %p2238_p7 }
  0xa6   : > { %p2241_p0 = pnand %p2240_p13, %p2234_p5 }
  0xa8   : > { %2244 = shalt.err (!%p2241_p0)
}
  0xa9   : > { %s2992_s24 = smov 8   ;;  %s2993_s20 = smov 128  }
  0xaa   : > { %1962 = dma.hbm_to_vmem [thread:$0]  (!%p2624_p10), %s2618_s21, 512, %s2620_s29, %s2628_s27, %s2993_s20, %s2993_s20, %s2992_s24  }
  0xab   : > { %p2994_p1 = scmp.ne.s32.totalorder %s2982_s17, 0 }
  0xac   : > { %s2662_s9 = sand.u32 (!%p2994_p1), 1, %s2323_s10  }
  0xad   : > { %376 = sbr.rel (%p2994_p1) target bundleno = 759 (0x2f7), region = 56  ;;  %s1838_s22 = sshll.u32 (!%p2994_p1), %s2662_s9, 5 }
  0xae   : > { %s379_s12 = scalar_lea.sflag (!%p2994_p1), [#allocation3], %s2662_s9  ;;  %s2668_s15 = scalar_lea.vmem (!%p2994_p1), [#allocation2], %s1838_s22 }
  0xb4   : > { %2298 = dma.done.wait (%p2593_p6), %s379_s12, 512  }
  0xb5   : > { %2300 = vsyncadd (%p2593_p6), %s379_s12, 4294966784  ;;  %p2995_p7 = scmp.ne.s32.totalorder %s2981_s16, 0 }
  0xb7   : > { %2302 = dma.done.wait (%p2995_p7), [#allocation6], 576  }
  0xb8   : > { %2304 = vsyncadd (%p2995_p7), [#allocation6], 4294966720 }
  0xb9   : > { %2306 = dma.done.wait (%p2995_p7), [#allocation9], 576  }
  0xba   : > { %2308 = vsyncadd (%p2995_p7), [#allocation9], 4294966720 }
  0xbb   : > { %2310 = dma.done.wait (%p2995_p7), [#allocation12], 256  }
  0xbc   : > { %2312 = vsyncadd (%p2995_p7), [#allocation12], 4294967040  ;;  %v446_v0 = vlaneseq  ;;  %v2351_v1 = vmov 0.0   ;;  %vm2352_vm0 = vmmov 0   ;;  %vm474_vm1 = vcmask 64512   ;;  %v437_v5 = vld [vmem:[%s2668_s15] sm:$0xff] }
  0xbd   : > { %1879 = vmatprep.subr.mxu0 %v2351_v1  ;;  %1884 = vmatprep.subr.mxu1 %v2351_v1  ;;  %v438_v6 = vld [vmem:[%s2668_s15 + $0x8] sm:$0xff]  ;;  %v441_v7 = vld [vmem:[#allocation5] sm:$0xff]  ;;  %v439_v9 = vld [vmem:[%s2668_s15 + $0x10] sm:$0xff]  ;;  %s2996_s17 = sld [smem:[#allocation20_spill]]  ;;  %s2997_s27 = sld [smem:[#allocation19_spill]]  ;;  %vm1672_vm10 = vcmask 130048  }
  0xbe   : > { %1881 = vmatprep.mubr.msk.f32.mxu0 %vm2352_vm0, %v2351_v1  ;;  %1886 = vmatprep.mubr.msk.f32.mxu1 %vm2352_vm0, %v2351_v1  ;;  %v447_v2 = vshrl.u32 %v446_v0, 7  ;;  %v442_v8 = vld [vmem:[#allocation5 + $0x8] sm:$0xff]  ;;  %v2702_v10 = vld [vmem:[%s2668_s15 + $0x18] sm:$0xff]  ;;  %v445_v11 = vld [vmem:[#allocation7] sm:$0xf]  ;;  %s436_s28 = scalar_lea.vmem [#allocation13], %s1838_s22 }
  0xbf   : > { %1880 = vmatpush3.msra.mxu0 %v437_v5  ;;  %1885 = vmatpush3.msra.mxu1 %v438_v6  ;;  %v443_v12 = vld [vmem:[#allocation5 + $0x10] sm:$0xff]  ;;  %v444_v13 = vld [vmem:[#allocation5 + $0x18] sm:$0xff]  ;;  %v879_v20 = vld [vmem:[#allocation10] sm:$0xf]  ;;  %s1692_s21 = sshll.u32 %s436_s28, 4  ;;  %s2998_s8 = sld [smem:[#allocation21_spill]]  ;;  %s2902_s21 = int_to_ptr.vmem [resolvable:$true] %s1692_s21 }
  0xc0   : > { %v2692_v3 = vsub.s32 0, %v447_v2  ;;  %v2694_v4 = vsub.s32 2, %v447_v2  ;;  %1882 = vmatmul.mubr.msk.f32.vlgmr.msra.gmra.mrb[0].mxu0 %vm474_vm1, %v441_v7  ;;  %1887 = vmatmul.mubr.msk.f32.vlgmr.msra.gmra.mrb[0].mxu1 %vm474_vm1, %v442_v8  ;;  %v2708_v16 = vsub.s32 1, %v447_v2  ;;  %v2710_v17 = vsub.s32 3, %v447_v2  ;;  %v1200_v21 = vld [vmem:[%s2965_s5] sm:$0xf] }
  0xc1   : > { %1889 = vmatprep.subr.mxu0 %v2351_v1  ;;  %1894 = vmatprep.subr.mxu1 %v2351_v1  ;;  %v1853_v26 = vld [vmem:[%s2965_s5 + $0x4] sm:$0xf]  ;;  %v1854_v33 = vld [vmem:[%s2965_s5 + $0x8] sm:$0xf]  ;;  %v1855_v38 = vld [vmem:[%s2965_s5 + $0xc] sm:$0xf] }
  0xc2   : > { %v449_v14 = vrot.slane %v445_v11, %v2692_v3  ;;  %v463_v15 = vrot.slane %v445_v11, %v2694_v4  ;;  %1890 = vmatpush3.msra.mxu0 %v439_v9  ;;  %1891 = vmatprep.mubr.msk.f32.mxu0 %vm2352_vm0, %v2351_v1  ;;  %v456_v18 = vrot.slane %v445_v11, %v2708_v16  ;;  %v1347_v45 = vld [vmem:[%s2966_s6] sm:$0xf]  ;;  %v1488_v50 = vld [vmem:[#allocation11] sm:$0xf]  ;;  %v1522_v55 = vld [vmem:[#allocation11 + $0x4] sm:$0xf] }
  0xc3   : > { %1895 = vmatpush3.msra.mxu1 %v2702_v10  ;;  %1896 = vmatprep.mubr.msk.f32.mxu1 %vm2352_vm0, %v2351_v1  ;;  %v470_v19 = vrot.slane %v445_v11, %v2710_v17  ;;  %v890_v22 = vrot.slane %v879_v20, %v2708_v16  ;;  %v883_v23 = vrot.slane %v879_v20, %v2692_v3  ;;  %v1560_v60 = vld [vmem:[#allocation11 + $0x8] sm:$0xf]  ;;  %v1598_v7 = vld [vmem:[#allocation11 + $0xc] sm:$0xf]  ;;  %s1862_s29 = sshll.u32 %s2997_s27, 9  ;;  %s1678_s20 = scalar_lea.sflag [#allocation4], %s2662_s9 }
  0xc4   : > { %1892 = vmatmul.mubr.msk.f32.vlgmr.msra.gmra.mrb[2].mxu0 %vm474_vm1, %v443_v12  ;;  %1897 = vmatmul.mubr.msk.f32.vlgmr.msra.gmra.mrb[2].mxu1 %vm474_vm1, %v444_v13  ;;  %v1204_v24 = vrot.slane %v1200_v21, %v2692_v3  ;;  %v897_v25 = vrot.slane %v879_v20, %v2694_v4  ;;  %v1238_v27 = vrot.slane %v1853_v26, %v2692_v3  ;;  %s2245_s12 = scalar_lea.vmem %s2902_s21, 512  ;;  %p2999_p5 = scmp.ne.s32.totalorder %s2989_s23, 0 }
  0xc5   : > { %451 = vbcast.lane.b32.xlu0 %v449_v14, 256  ;;  %465 = vbcast.lane.b32.xlu1 %v463_v15, 256  ;;  %v1211_v28 = vrot.slane %v1200_v21, %v2708_v16  ;;  %v904_v29 = vrot.slane %v879_v20, %v2710_v17  ;;  %v1245_v30 = vrot.slane %v1853_v26, %v2708_v16  ;;  %s2907_s24 = scalar_lea.hbm %s2998_s8, %s1862_s29  ;;  %p2246_p6 = scmp.ne.s32.totalorder %s2902_s21, %s2245_s12 }
  0xc6   : > { %1899 = vmatprep.subr.mxu0 %v2351_v1  ;;  %1904 = vmatprep.subr.mxu1 %v2351_v1  ;;  %v1252_v31 = vrot.slane %v1853_v26, %v2694_v4  ;;  %v1218_v32 = vrot.slane %v1200_v21, %v2694_v4  ;;  %v1283_v34 = vrot.slane %v1854_v33, %v2708_v16  ;;  %s2353_s16 = smov [#allocation13]  }
  0xc7   : > { %1901 = vmatprep.mubr.msk.f32.mxu0 %vm2352_vm0, %v2351_v1  ;;  %1906 = vmatprep.mubr.msk.f32.mxu1 %vm2352_vm0, %v2351_v1  ;;  %v1276_v35 = vrot.slane %v1854_v33, %v2692_v3  ;;  %v1259_v36 = vrot.slane %v1853_v26, %v2710_v17  ;;  %v1225_v37 = vrot.slane %v1200_v21, %v2710_v17  ;;  %p2247_p10 = pnand %p2246_p6, %p2999_p5 }
  0xc8   : > { %v1314_v39 = vrot.slane %v1855_v38, %v2692_v3  ;;  %v1290_v40 = vrot.slane %v1854_v33, %v2694_v4  ;;  %v1297_v41 = vrot.slane %v1854_v33, %v2710_v17  ;;  %v1321_v42 = vrot.slane %v1855_v38, %v2708_v16 }
  0xc9   : > { %458 = vbcast.lane.b32.xlu0 %v456_v18, 256  ;;  %472 = vbcast.lane.b32.xlu1 %v470_v19, 256  ;;  %v1335_v43 = vrot.slane %v1855_v38, %v2710_v17  ;;  %v1328_v44 = vrot.slane %v1855_v38, %v2694_v4  ;;  %v1358_v46 = vrot.slane %v1347_v45, %v2708_v16  ;;  %p2248_p11 = pneg %p2247_p10 }
  0xca   : > { %v1351_v47 = vrot.slane %v1347_v45, %v2692_v3  ;;  %v1372_v48 = vrot.slane %v1347_v45, %v2710_v17  ;;  %v1365_v49 = vrot.slane %v1347_v45, %v2694_v4  ;;  %v1499_v51 = vrot.slane %v1488_v50, %v2708_v16 }
  0xcb   : > { %v1492_v52 = vrot.slane %v1488_v50, %v2692_v3  ;;  %v1513_v53 = vrot.slane %v1488_v50, %v2710_v17  ;;  %v1506_v54 = vrot.slane %v1488_v50, %v2694_v4  ;;  %v1533_v56 = vrot.slane %v1522_v55, %v2708_v16 }
  0xcc   : > { %v1526_v57 = vrot.slane %v1522_v55, %v2692_v3  ;;  %v1547_v58 = vrot.slane %v1522_v55, %v2710_v17  ;;  %v1540_v59 = vrot.slane %v1522_v55, %v2694_v4  ;;  %v1571_v62 = vrot.slane %v1560_v60, %v2708_v16 }
  0xcd   : > { %892 = vbcast.lane.b32.xlu1 %v890_v22, 256  ;;  %885 = vbcast.lane.b32.xlu0 %v883_v23, 256  ;;  %v1564_v63 = vrot.slane %v1560_v60, %v2692_v3  ;;  %v1585_v2 = vrot.slane %v1560_v60, %v2710_v17  ;;  %v1578_v5 = vrot.slane %v1560_v60, %v2694_v4 }
  0xce   : > { %v1609_v15 = vrot.slane %v1598_v7, %v2708_v16  ;;  %v1602_v18 = vrot.slane %v1598_v7, %v2692_v3  ;;  %v1616_v33 = vrot.slane %v1598_v7, %v2694_v4 }
  0xd1   : > { %1206 = vbcast.lane.b32.xlu1 %v1204_v24, 256  ;;  %899 = vbcast.lane.b32.xlu0 %v897_v25, 256 }
  0xd5   : > { %1240 = vbcast.lane.b32.xlu1 %v1238_v27, 256  ;;  %1213 = vbcast.lane.b32.xlu0 %v1211_v28, 256 }
  0xd9   : > { %906 = vbcast.lane.b32.xlu1 %v904_v29, 256  ;;  %1247 = vbcast.lane.b32.xlu0 %v1245_v30, 256 }
  0xdd   : > { %1254 = vbcast.lane.b32.xlu1 %v1252_v31, 256  ;;  %1220 = vbcast.lane.b32.xlu0 %v1218_v32, 256  ;;  %v1623_v32 = vrot.slane %v1598_v7, %v2710_v17 }
  0xe1   : > { %1285 = vbcast.lane.b32.xlu1 %v1283_v34, 256  ;;  %1278 = vbcast.lane.b32.xlu0 %v1276_v35, 256 }
  0xe5   : > { %1261 = vbcast.lane.b32.xlu1 %v1259_v36, 256  ;;  %1227 = vbcast.lane.b32.xlu0 %v1225_v37, 256  ;;  %v1635_v36 = vld [vmem:[%s2996_s17] sm:$0xf]  ;;  %s2249_s17 = sshll.u32 %s2353_s16, 4  ;;  %s2250_s17 = int_to_ptr.vmem [resolvable:$false] %s2249_s17 }
  0xe6   : > { %s2251_s27 = scalar_lea.vmem %s2250_s17, 1024  ;;  %p2252_p2 = scmp.lt.s32.totalorder %s2902_s21, %s2250_s17 }
  0xe7   : > { %p2253_p4 = scmp.lt.s32.totalorder %s2251_s27, %s2245_s12 }
  0xe9   : > { %1316 = vbcast.lane.b32.xlu1 %v1314_v39, 256  ;;  %1292 = vbcast.lane.b32.xlu0 %v1290_v40, 256  ;;  %p2254_p9 = por %p2253_p4, %p2252_p2 }
  0xeb   : > { %p2255_p8 = pnand %p2254_p9, %p2248_p11 }
  0xed   : > { %1299 = vbcast.lane.b32.xlu1 %v1297_v41, 256  ;;  %1323 = vbcast.lane.b32.xlu0 %v1321_v42, 256  ;;  %v1646_v41 = vrot.slane %v1635_v36, %v2708_v16  ;;  %v1639_v42 = vrot.slane %v1635_v36, %v2692_v3 }
  0xf1   : > { %1337 = vbcast.lane.b32.xlu1 %v1335_v43, 256  ;;  %1330 = vbcast.lane.b32.xlu0 %v1328_v44, 256 }
  0xf5   : > { %1360 = vbcast.lane.b32.xlu1 %v1358_v46, 256  ;;  %1353 = vbcast.lane.b32.xlu0 %v1351_v47, 256  ;;  %v1660_v47 = vrot.slane %v1635_v36, %v2710_v17 }
  0xf9   : > { %1374 = vbcast.lane.b32.xlu1 %v1372_v48, 256  ;;  %1367 = vbcast.lane.b32.xlu0 %v1365_v49, 256  ;;  %v1653_v48 = vrot.slane %v1635_v36, %v2694_v4 }
  0xfd   : > { %1501 = vbcast.lane.b32.xlu1 %v1499_v51, 256  ;;  %1494 = vbcast.lane.b32.xlu0 %v1492_v52, 256 }
 0x101   : > { %1515 = vbcast.lane.b32.xlu1 %v1513_v53, 256  ;;  %1508 = vbcast.lane.b32.xlu0 %v1506_v54, 256 }
 0x105   : > { %1535 = vbcast.lane.b32.xlu1 %v1533_v56, 256  ;;  %1528 = vbcast.lane.b32.xlu0 %v1526_v57, 256 }
 0x109   : > { %1549 = vbcast.lane.b32.xlu1 %v1547_v58, 256  ;;  %1542 = vbcast.lane.b32.xlu0 %v1540_v59, 256 }
 0x10d   : > { %1573 = vbcast.lane.b32.xlu1 %v1571_v62, 256  ;;  %1566 = vbcast.lane.b32.xlu0 %v1564_v63, 256 }
 0x111   : > { %1587 = vbcast.lane.b32.xlu1 %v1585_v2, 256  ;;  %1580 = vbcast.lane.b32.xlu0 %v1578_v5, 256 }
 0x115   : > { %1611 = vbcast.lane.b32.xlu1 %v1609_v15, 256  ;;  %1604 = vbcast.lane.b32.xlu0 %v1602_v18, 256 }
 0x119   : > { %1625 = vbcast.lane.b32.xlu1 %v1623_v32, 256  ;;  %1618 = vbcast.lane.b32.xlu0 %v1616_v33, 256 }
 0x11d   : > { %1648 = vbcast.lane.b32.xlu1 %v1646_v41, 256  ;;  %1641 = vbcast.lane.b32.xlu0 %v1639_v42, 256 }
 0x121   : > { %1662 = vbcast.lane.b32.xlu1 %v1660_v47, 256  ;;  %1655 = vbcast.lane.b32.xlu0 %v1653_v48, 256 }
 0x137   : > { %v452_v61 = vpop.permute.xlu0 %451  ;;  %v466_v0 = vpop.permute.xlu1 %465 }
 0x13b   : > { %v459_v6 = vpop.permute.xlu0 %458  ;;  %v473_v21 = vpop.permute.xlu1 %472 }
 0x193   : > { %v544_v8 = vpop.f32.mrb[0].mxu0  ;;  %v617_v9 = vpop.f32.mrb[0].mxu1 }
 0x194   : > { %v2778_v11 = vadd.f32 %v544_v8, %v452_v61  ;;  %v2780_v12 = vadd.f32 %v617_v9, %v459_v6  ;;  %v1883_v13 = vpop.f32.mrb[1].mxu0  ;;  %v1888_v14 = vpop.f32.mrb[1].mxu1 }
 0x196   : > { %v2785_v19 = vmul.f32 0.70710677, %v2778_v11  ;;  %v2788_v20 = vmul.f32 0.70710677, %v2780_v12 }
 0x197   : > { %v690_v22 = vpop.f32.mrb[2].mxu0  ;;  %v763_v23 = vpop.f32.mrb[2].mxu1 }
 0x198   : > { %v771_v24 = vand.u32 2147483647, %v2785_v19  ;;  %v772_v25 = vand.u32 2147483647, %v2788_v20  ;;  %v2792_v26 = vadd.f32 %v690_v22, %v466_v0  ;;  %v2794_v27 = vadd.f32 %v763_v23, %v473_v21  ;;  %v1893_v28 = vpop.f32.mrb[3].mxu0  ;;  %v1898_v29 = vpop.f32.mrb[3].mxu1 }
 0x199   : > { %vm851_vm2 = vcmp.lt.f32.partialorder %v2785_v19, 0.0  ;;  %vm852_vm3 = vcmp.lt.f32.partialorder %v2788_v20, 0.0 }
 0x19a   : > { %v775_v30 = vmul.f32 0.3275911, %v771_v24  ;;  %v776_v31 = vmul.f32 0.3275911, %v772_v25  ;;  %v2799_v34 = vmul.f32 0.70710677, %v2792_v26 }
 0x19b   : > { %v2802_v35 = vmul.f32 0.70710677, %v2794_v27  ;;  %v827_v49 = vsub.f32 0.0, %v771_v24  ;;  %v828_v50 = vsub.f32 0.0, %v772_v25 }
 0x19c   : > { %v779_v37 = vadd.f32 1.0, %v775_v30  ;;  %v780_v38 = vadd.f32 1.0, %v776_v31  ;;  %v773_v39 = vand.u32 2147483647, %v2799_v34  ;;  %vm853_vm4 = vcmp.lt.f32.partialorder %v2799_v34, 0.0 }
 0x19d   : > { %v774_v40 = vand.u32 2147483647, %v2802_v35  ;;  %v831_v51 = vmul.f32 %v827_v49, %v771_v24  ;;  %v832_v53 = vmul.f32 %v828_v50, %v772_v25  ;;  %vm854_vm5 = vcmp.lt.f32.partialorder %v2802_v35, 0.0  ;;  %v877_v35 = vld [vmem:[#allocation8 + $0x10] sm:$0xff] }
 0x19e   : > { %2040 = vrcp.f32 %v779_v37  ;;  %v777_v43 = vmul.f32 0.3275911, %v773_v39  ;;  %v829_v54 = vsub.f32 0.0, %v773_v39 }
 0x19f   : > { %2042 = vrcp.f32 %v780_v38  ;;  %v778_v44 = vmul.f32 0.3275911, %v774_v40  ;;  %v830_v56 = vsub.f32 0.0, %v774_v40  ;;  %v835_v58 = vmul.f32 1.442695, %v831_v51 }
 0x1a0   : > { %v781_v45 = vadd.f32 1.0, %v777_v43  ;;  %v837_v4 = vmul.f32 1.442695, %v832_v53  ;;  %v833_v61 = vmul.f32 %v829_v54, %v773_v39 }
 0x1a1   : > { %v782_v46 = vadd.f32 1.0, %v778_v44  ;;  %v834_v2 = vmul.f32 %v830_v56, %v774_v40 }
 0x1a2   : > { %2044 = vrcp.f32 %v781_v45  ;;  %v839_v13 = vmul.f32 1.442695, %v833_v61  ;;  %v864_v61 = vmul.f32 0.5, %v2780_v12  ;;  %v866_v12 = vmul.f32 0.5, %v2794_v27  ;;  %v893_v27 = vpop.permute.xlu1 %892 }
 0x1a3   : > { %2046 = vrcp.f32 %v782_v46  ;;  %v841_v21 = vmul.f32 1.442695, %v834_v2  ;;  %v875_v2 = vld [vmem:[#allocation8] sm:$0xff] }
 0x1a4   : > { %2048 = vpow2.f32 %v835_v58  ;;  %v863_v58 = vmul.f32 0.5, %v2778_v11  ;;  %v865_v11 = vmul.f32 0.5, %v2792_v26 }
 0x1a5   : > { %2050 = vpow2.f32 %v837_v4 }
 0x1a6   : > { %2052 = vpow2.f32 %v839_v13  ;;  %v878_v13 = vld [vmem:[#allocation8 + $0x18] sm:$0xff] }
 0x1a7   : > { %2054 = vpow2.f32 %v841_v21 }
 0x1a8   : > { %v2041_v16 = vpop.eup %2040 }
 0x1a9   : > { %v2043_v3 = vpop.eup %2042  ;;  %v791_v52 = vmul.f32 1.0614054, %v2041_v16 }
 0x1aa   : > { %v792_v55 = vmul.f32 1.0614054, %v2043_v3 }
 0x1ab   : > { %v795_v57 = vadd.f32 -1.4531521, %v791_v52 }
 0x1ac   : > { %v796_v59 = vadd.f32 -1.4531521, %v792_v55  ;;  %v2045_v17 = vpop.eup %2044 }
 0x1ad   : > { %v799_v60 = vmul.f32 %v2041_v16, %v795_v57  ;;  %v2047_v62 = vpop.eup %2046  ;;  %v793_v0 = vmul.f32 1.0614054, %v2045_v17 }
 0x1ae   : > { %v800_v63 = vmul.f32 %v2043_v3, %v796_v59  ;;  %v794_v6 = vmul.f32 1.0614054, %v2047_v62  ;;  %v2049_v40 = vpop.eup %2048 }
 0x1af   : > { %v803_v5 = vadd.f32 1.4214138, %v799_v60  ;;  %v797_v8 = vadd.f32 -1.4531521, %v793_v0  ;;  %v2051_v43 = vpop.eup %2050 }
 0x1b0   : > { %v804_v7 = vadd.f32 1.4214138, %v800_v63  ;;  %v798_v14 = vadd.f32 -1.4531521, %v794_v6  ;;  %v2053_v52 = vpop.eup %2052  ;;  %v876_v6 = vld [vmem:[#allocation8 + $0x8] sm:$0xff] }
 0x1b1   : > { %v807_v9 = vmul.f32 %v2041_v16, %v803_v5  ;;  %v801_v18 = vmul.f32 %v2045_v17, %v797_v8  ;;  %v2055_v55 = vpop.eup %2054 }
 0x1b2   : > { %v808_v15 = vmul.f32 %v2043_v3, %v804_v7  ;;  %v802_v23 = vmul.f32 %v2047_v62, %v798_v14  ;;  %v886_v14 = vpop.permute.xlu0 %885 }
 0x1b3   : > { %v811_v22 = vadd.f32 -0.28449672, %v807_v9  ;;  %v805_v25 = vadd.f32 1.4214138, %v801_v18 }
 0x1b4   : > { %v812_v24 = vadd.f32 -0.28449672, %v808_v15  ;;  %v806_v29 = vadd.f32 1.4214138, %v802_v23  ;;  %v1207_v15 = vpop.permute.xlu1 %1206 }
 0x1b5   : > { %v815_v28 = vmul.f32 %v2041_v16, %v811_v22  ;;  %v809_v31 = vmul.f32 %v2045_v17, %v805_v25 }
 0x1b6   : > { %v816_v30 = vmul.f32 %v2043_v3, %v812_v24  ;;  %v810_v33 = vmul.f32 %v2047_v62, %v806_v29  ;;  %v900_v18 = vpop.permute.xlu0 %899 }
 0x1b7   : > { %v819_v32 = vadd.f32 0.2548296, %v815_v28  ;;  %v813_v37 = vadd.f32 -0.28449672, %v809_v31 }
 0x1b8   : > { %v820_v36 = vadd.f32 0.2548296, %v816_v30  ;;  %v814_v39 = vadd.f32 -0.28449672, %v810_v33  ;;  %v1241_v21 = vpop.permute.xlu1 %1240 }
 0x1b9   : > { %v823_v38 = vmul.f32 %v2041_v16, %v819_v32  ;;  %v817_v42 = vmul.f32 %v2045_v17, %v813_v37 }
 0x1ba   : > { %v824_v41 = vmul.f32 %v2043_v3, %v820_v36  ;;  %v818_v45 = vmul.f32 %v2047_v62, %v814_v39  ;;  %v1214_v22 = vpop.permute.xlu0 %1213 }
 0x1bb   : > { %v843_v44 = vmul.f32 %v2049_v40, %v823_v38  ;;  %v821_v47 = vadd.f32 0.2548296, %v817_v42 }
 0x1bc   : > { %v844_v46 = vmul.f32 %v2051_v43, %v824_v41  ;;  %v822_v49 = vadd.f32 0.2548296, %v818_v45  ;;  %v907_v23 = vpop.permute.xlu1 %906 }
 0x1bd   : > { %v847_v48 = vsub.f32 1.0, %v843_v44  ;;  %v825_v51 = vmul.f32 %v2045_v17, %v821_v47 }
 0x1be   : > { %v848_v50 = vsub.f32 1.0, %v844_v46  ;;  %v826_v54 = vmul.f32 %v2047_v62, %v822_v49  ;;  %v1248_v24 = vpop.permute.xlu0 %1247 }
 0x1bf   : > { %v855_v53 = vsub.f32 0.0, %v847_v48  ;;  %v845_v56 = vmul.f32 %v2053_v52, %v825_v51 }
 0x1c0   : > { %v856_v16 = vsub.f32 0.0, %v848_v50  ;;  %v846_v3 = vmul.f32 %v2055_v55, %v826_v54  ;;  %v1255_v25 = vpop.permute.xlu1 %1254 }
 0x1c1   : > { %v859_v57 = vsel %vm851_vm2, %v855_v53, %v847_v48  ;;  %v849_v4 = vsub.f32 1.0, %v845_v56 }
 0x1c2   : > { %v867_v59 = vadd.f32 1.0, %v859_v57  ;;  %v860_v60 = vsel %vm852_vm3, %v856_v16, %v848_v50  ;;  %v850_v63 = vsub.f32 1.0, %v846_v3  ;;  %v1221_v28 = vpop.permute.xlu0 %1220 }
 0x1c3   : > { %v868_v17 = vadd.f32 1.0, %v860_v60  ;;  %v857_v62 = vsub.f32 0.0, %v849_v4 }
 0x1c4   : > { %v871_v0 = vmul.f32 %v867_v59, %v863_v58  ;;  %v858_v19 = vsub.f32 0.0, %v850_v63  ;;  %v1286_v29 = vpop.permute.xlu1 %1285 }
 0x1c5   : > { %v872_v5 = vmul.f32 %v868_v17, %v864_v61  ;;  %v861_v7 = vsel %vm853_vm4, %v857_v62, %v849_v4 }
 0x1c6   : > { %1900 = vmatpush3.msra.mxu0 %v871_v0  ;;  %v869_v20 = vadd.f32 1.0, %v861_v7  ;;  %v862_v8 = vsel %vm854_vm5, %v858_v19, %v850_v63  ;;  %v1279_v30 = vpop.permute.xlu0 %1278 }
 0x1c7   : > { %1905 = vmatpush3.msra.mxu1 %v872_v5  ;;  %1902 = vmatmul.mubr.msk.f32.vlgmr.msra.gmra.mrb[4].mxu0 %vm474_vm1, %v875_v2  ;;  %v870_v9 = vadd.f32 1.0, %v862_v8 }
 0x1c8   : > { %1907 = vmatmul.mubr.msk.f32.vlgmr.msra.gmra.mrb[4].mxu1 %vm474_vm1, %v876_v6  ;;  %1909 = vmatprep.subr.mxu0 %v2351_v1  ;;  %v873_v34 = vmul.f32 %v869_v20, %v865_v11 }
 0x1c9   : > { %1914 = vmatprep.subr.mxu1 %v2351_v1  ;;  %1911 = vmatprep.mubr.msk.f32.mxu0 %vm2352_vm0, %v2351_v1  ;;  %v874_v26 = vmul.f32 %v870_v9, %v866_v12 }
 0x1ca   : > { %1916 = vmatprep.mubr.msk.f32.mxu1 %vm2352_vm0, %v2351_v1  ;;  %1910 = vmatpush3.msra.mxu0 %v873_v34  ;;  %v1262_v1 = vpop.permute.xlu1 %1261  ;;  %v1228_v31 = vpop.permute.xlu0 %1227 }
 0x1cb   : > { %1915 = vmatpush3.msra.mxu1 %v874_v26  ;;  %1912 = vmatmul.mubr.msk.f32.vlgmr.msra.gmra.mrb[6].mxu0 %vm474_vm1, %v877_v35 }
 0x1cc   : > { %1917 = vmatmul.mubr.msk.f32.vlgmr.msra.gmra.mrb[6].mxu1 %vm474_vm1, %v878_v13 }
 0x1ce   : > { %v1317_v32 = vpop.permute.xlu1 %1316  ;;  %v1293_v33 = vpop.permute.xlu0 %1292 }
 0x1d2   : > { %v1300_v36 = vpop.permute.xlu1 %1299  ;;  %v1324_v37 = vpop.permute.xlu0 %1323 }
 0x1d6   : > { %v1338_v38 = vpop.permute.xlu1 %1337  ;;  %v1331_v39 = vpop.permute.xlu0 %1330 }
 0x1da   : > { %v1361_v50 = vpop.permute.xlu1 %1360  ;;  %v1354_v16 = vpop.permute.xlu0 %1353 }
 0x1de   : > { %v1375_v9 = vpop.permute.xlu1 %1374  ;;  %v1368_v34 = vpop.permute.xlu0 %1367 }
 0x29a   : > { %v977_v40 = vpop.f32.mrb[4].mxu0 }
 0x29b   : > { %v978_v41 = vadd.f32 %v977_v40, %v886_v14  ;;  %v1050_v42 = vpop.f32.mrb[4].mxu1  ;;  %v1903_v43 = vpop.f32.mrb[5].mxu0 }
 0x29c   : > { %v1051_v44 = vadd.f32 %v1050_v42, %v893_v27  ;;  %v1908_v45 = vpop.f32.mrb[5].mxu1 }
 0x29d   : > { %v1230_v46 = vmul.f32 %v1214_v22, %v978_v41  ;;  %v1229_v47 = vmul.f32 %v1207_v15, %v978_v41  ;;  %v1232_v48 = vmul.f32 %v1228_v31, %v978_v41  ;;  %v1231_v49 = vmul.f32 %v1221_v28, %v978_v41  ;;  %v2855_v31 = vpop.permute.xlu1 %1501 }
 0x29e   : > { %v1264_v51 = vmul.f32 %v1248_v24, %v1051_v44  ;;  %v1263_v52 = vmul.f32 %v1241_v21, %v1051_v44  ;;  %v1266_v53 = vmul.f32 %v1262_v1, %v1051_v44  ;;  %v1265_v54 = vmul.f32 %v1255_v25, %v1051_v44  ;;  %v1123_v55 = vpop.f32.mrb[6].mxu0 }
 0x29f   : > { %v1124_v56 = vadd.f32 %v1123_v55, %v900_v18  ;;  %v1196_v57 = vpop.f32.mrb[6].mxu1  ;;  %v1913_v3 = vpop.f32.mrb[7].mxu0 }
 0x2a0   : > { %v1268_v58 = vadd.f32 %v1264_v51, %v1230_v46  ;;  %v1267_v59 = vadd.f32 %v1263_v52, %v1229_v47  ;;  %v1270_v60 = vadd.f32 %v1266_v53, %v1232_v48  ;;  %v1197_v4 = vadd.f32 %v1196_v57, %v907_v23  ;;  %v1918_v61 = vpop.f32.mrb[7].mxu1 }
 0x2a1   : > { %v1269_v17 = vadd.f32 %v1265_v54, %v1231_v49  ;;  %v1302_v63 = vmul.f32 %v1286_v29, %v1124_v56  ;;  %v1301_v0 = vmul.f32 %v1279_v30, %v1124_v56  ;;  %v1304_v62 = vmul.f32 %v1300_v36, %v1124_v56  ;;  %v2859_v42 = vpop.permute.xlu1 %1515 }
 0x2a2   : > { %v1303_v2 = vmul.f32 %v1293_v33, %v1124_v56  ;;  %v1340_v5 = vmul.f32 %v1324_v37, %v1197_v4  ;;  %v1339_v19 = vmul.f32 %v1317_v32, %v1197_v4  ;;  %v1342_v6 = vmul.f32 %v1338_v38, %v1197_v4  ;;  %v2857_v32 = vpop.permute.xlu0 %1494 }
 0x2a3   : > { %v1341_v7 = vmul.f32 %v1331_v39, %v1197_v4  ;;  %v1306_v11 = vadd.f32 %v1302_v63, %v1268_v58  ;;  %v1305_v20 = vadd.f32 %v1301_v0, %v1267_v59  ;;  %v1308_v8 = vadd.f32 %v1304_v62, %v1270_v60 }
 0x2a4   : > { %v1307_v12 = vadd.f32 %v1303_v2, %v1269_v17 }
 0x2a5   : > { %v1344_v35 = vadd.f32 %v1340_v5, %v1306_v11  ;;  %v1343_v26 = vadd.f32 %v1339_v19, %v1305_v20  ;;  %v1346_v13 = vadd.f32 %v1342_v6, %v1308_v8  ;;  %v2863_v47 = vpop.permute.xlu1 %1535 }
 0x2a6   : > { %v1345_v27 = vadd.f32 %v1341_v7, %v1307_v12  ;;  %v2861_v43 = vpop.permute.xlu0 %1508 }
 0x2a7   : > { %v2831_v14 = vadd.f32 %v1361_v50, %v1344_v35  ;;  %v2833_v15 = vadd.f32 %v1354_v16, %v1343_v26  ;;  %v2835_v18 = vadd.f32 %v1375_v9, %v1346_v13 }
 0x2a8   : > { %v2837_v21 = vadd.f32 %v1368_v34, %v1345_v27 }
 0x2a9   : > { %v2840_v22 = vmul.f32 0.70710677, %v2831_v14  ;;  %v2843_v23 = vmul.f32 0.70710677, %v2833_v15  ;;  %v2846_v24 = vmul.f32 0.70710677, %v2835_v18  ;;  %v2867_v57 = vpop.permute.xlu1 %1549 }
 0x2aa   : > { %v2849_v25 = vmul.f32 0.70710677, %v2837_v21  ;;  %v2865_v48 = vpop.permute.xlu0 %1528 }
 0x2ab   : > { %v1385_v28 = vand.u32 2147483647, %v2840_v22  ;;  %v1384_v29 = vand.u32 2147483647, %v2843_v23  ;;  %v1387_v30 = vand.u32 2147483647, %v2846_v24 }
 0x2ac   : > { %v1386_v1 = vand.u32 2147483647, %v2849_v25  ;;  %vm1465_vm6 = vcmp.lt.f32.partialorder %v2840_v22, 0.0  ;;  %vm1464_vm7 = vcmp.lt.f32.partialorder %v2843_v23, 0.0  ;;  %vm1467_vm8 = vcmp.lt.f32.partialorder %v2846_v24, 0.0 }
 0x2ad   : > { %v1389_v33 = vmul.f32 0.3275911, %v1385_v28  ;;  %v1388_v36 = vmul.f32 0.3275911, %v1384_v29  ;;  %v1391_v37 = vmul.f32 0.3275911, %v1387_v30  ;;  %v2871_v9 = vpop.permute.xlu1 %1573 }
 0x2ae   : > { %v1390_v40 = vmul.f32 0.3275911, %v1386_v1  ;;  %v1441_v45 = vsub.f32 0.0, %v1385_v28  ;;  %v1440_v46 = vsub.f32 0.0, %v1384_v29  ;;  %v1443_v51 = vsub.f32 0.0, %v1387_v30  ;;  %v2869_v3 = vpop.permute.xlu0 %1542 }
 0x2af   : > { %v1393_v38 = vadd.f32 1.0, %v1389_v33  ;;  %v1392_v39 = vadd.f32 1.0, %v1388_v36  ;;  %v1395_v41 = vadd.f32 1.0, %v1391_v37  ;;  %v1442_v16 = vsub.f32 0.0, %v1386_v1 }
 0x2b0   : > { %v1394_v44 = vadd.f32 1.0, %v1390_v40  ;;  %v1445_v50 = vmul.f32 %v1441_v45, %v1385_v28  ;;  %v1444_v54 = vmul.f32 %v1440_v46, %v1384_v29  ;;  %v1447_v4 = vmul.f32 %v1443_v51, %v1387_v30 }
 0x2b1   : > { %2056 = vrcp.f32 %v1393_v38  ;;  %v1446_v2 = vmul.f32 %v1442_v16, %v1386_v1  ;;  %v2875_v40 = vpop.permute.xlu1 %1587  ;;  %v1479_v22 = vmul.f32 0.5, %v2835_v18  ;;  %vm1466_vm9 = vcmp.lt.f32.partialorder %v2849_v25, 0.0 }
 0x2b2   : > { %2058 = vrcp.f32 %v1392_v39  ;;  %v1450_v59 = vmul.f32 1.442695, %v1445_v50  ;;  %v1448_v17 = vmul.f32 1.442695, %v1444_v54  ;;  %v1454_v11 = vmul.f32 1.442695, %v1447_v4  ;;  %v2873_v34 = vpop.permute.xlu0 %1566 }
 0x2b3   : > { %2060 = vrcp.f32 %v1395_v41  ;;  %v1452_v26 = vmul.f32 1.442695, %v1446_v2  ;;  %v1478_v18 = vmul.f32 0.5, %v2837_v21 }
 0x2b4   : > { %2062 = vrcp.f32 %v1394_v44 }
 0x2b5   : > { %2064 = vpow2.f32 %v1450_v59 }
 0x2b6   : > { %2066 = vpow2.f32 %v1448_v17  ;;  %v2877_v41 = vpop.permute.xlu0 %1580  ;;  %v1612_v17 = vpop.permute.xlu1 %1611 }
 0x2b7   : > { %2068 = vpow2.f32 %v1454_v11 }
 0x2b8   : > { %2070 = vpow2.f32 %v1452_v26 }
 0x2bb   : > { %v2057_v49 = vpop.eup %2056 }
 0x2bc   : > { %v2059_v52 = vpop.eup %2058  ;;  %v1405_v53 = vmul.f32 1.0614054, %v2057_v49 }
 0x2bd   : > { %v1404_v55 = vmul.f32 1.0614054, %v2059_v52  ;;  %v2061_v58 = vpop.eup %2060 }
 0x2be   : > { %v1409_v56 = vadd.f32 -1.4531521, %v1405_v53  ;;  %v1407_v63 = vmul.f32 1.0614054, %v2061_v58  ;;  %v2063_v0 = vpop.eup %2062 }
 0x2bf   : > { %v1408_v60 = vadd.f32 -1.4531521, %v1404_v55  ;;  %v1406_v6 = vmul.f32 1.0614054, %v2063_v0  ;;  %v2065_v51 = vpop.eup %2064 }
 0x2c0   : > { %v1413_v61 = vmul.f32 %v2057_v49, %v1409_v56  ;;  %v1411_v19 = vadd.f32 -1.4531521, %v1407_v63  ;;  %v2067_v54 = vpop.eup %2066  ;;  %v1605_v63 = vpop.permute.xlu0 %1604 }
 0x2c1   : > { %v1412_v62 = vmul.f32 %v2059_v52, %v1408_v60  ;;  %v1410_v12 = vadd.f32 -1.4531521, %v1406_v6 }
 0x2c2   : > { %v1417_v5 = vadd.f32 1.4214138, %v1413_v61  ;;  %v1415_v8 = vmul.f32 %v2061_v58, %v1411_v19 }
 0x2c3   : > { %v1416_v7 = vadd.f32 1.4214138, %v1412_v62  ;;  %v1414_v28 = vmul.f32 %v2063_v0, %v1410_v12  ;;  %v2069_v62 = vpop.eup %2068 }
 0x2c4   : > { %v1421_v20 = vmul.f32 %v2057_v49, %v1417_v5  ;;  %v1419_v27 = vadd.f32 1.4214138, %v1415_v8  ;;  %v1477_v8 = vmul.f32 0.5, %v2831_v14 }
 0x2c5   : > { %v1420_v35 = vmul.f32 %v2059_v52, %v1416_v7  ;;  %v1418_v33 = vadd.f32 1.4214138, %v1414_v28  ;;  %v1626_v28 = vpop.permute.xlu1 %1625 }
 0x2c6   : > { %v1425_v13 = vadd.f32 -0.28449672, %v1421_v20  ;;  %v1423_v1 = vmul.f32 %v2061_v58, %v1419_v27 }
 0x2c7   : > { %v1424_v29 = vadd.f32 -0.28449672, %v1420_v35  ;;  %v1422_v39 = vmul.f32 %v2063_v0, %v1418_v33  ;;  %v1476_v35 = vmul.f32 0.5, %v2833_v15 }
 0x2c8   : > { %v1429_v30 = vmul.f32 %v2057_v49, %v1425_v13  ;;  %v1427_v38 = vadd.f32 -0.28449672, %v1423_v1 }
 0x2c9   : > { %v1428_v36 = vmul.f32 %v2059_v52, %v1424_v29  ;;  %v1426_v50 = vadd.f32 -0.28449672, %v1422_v39 }
 0x2ca   : > { %v1433_v37 = vadd.f32 0.2548296, %v1429_v30  ;;  %v1431_v46 = vmul.f32 %v2061_v58, %v1427_v38 }
 0x2cb   : > { %v1432_v44 = vadd.f32 0.2548296, %v1428_v36  ;;  %v1430_v56 = vmul.f32 %v2063_v0, %v1426_v50 }
 0x2cc   : > { %v1437_v45 = vmul.f32 %v2057_v49, %v1433_v37  ;;  %v1435_v16 = vadd.f32 0.2548296, %v1431_v46  ;;  %v2071_v49 = vpop.eup %2070 }
 0x2cd   : > { %v1436_v53 = vmul.f32 %v2059_v52, %v1432_v44  ;;  %v1434_v61 = vadd.f32 0.2548296, %v1430_v56 }
 0x2ce   : > { %v1457_v55 = vmul.f32 %v2065_v51, %v1437_v45  ;;  %v1439_v4 = vmul.f32 %v2061_v58, %v1435_v16  ;;  %v1649_v51 = vpop.permute.xlu1 %1648 }
 0x2cf   : > { %v1456_v59 = vmul.f32 %v2067_v54, %v1436_v53  ;;  %v1438_v6 = vmul.f32 %v2063_v0, %v1434_v61  ;;  %v1619_v0 = vpop.permute.xlu0 %1618 }
 0x2d0   : > { %v1461_v60 = vsub.f32 1.0, %v1457_v55  ;;  %v1459_v19 = vmul.f32 %v2069_v62, %v1439_v4 }
 0x2d1   : > { %v1460_v2 = vsub.f32 1.0, %v1456_v59  ;;  %v1458_v20 = vmul.f32 %v2071_v49, %v1438_v6  ;;  %v2073_v49 = vld [vmem:[%s2668_s15] sm:$0xff] }
 0x2d2   : > { %v1469_v5 = vsub.f32 0.0, %v1461_v60  ;;  %v1463_v11 = vsub.f32 1.0, %v1459_v19  ;;  %v2072_v19 = vld [vmem:[%s2668_s15 + $0x8] sm:$0xff] }
 0x2d3   : > { %v1468_v7 = vsub.f32 0.0, %v1460_v2  ;;  %v1462_v27 = vsub.f32 1.0, %v1458_v20 }
 0x2d4   : > { %v1473_v52 = vsel %vm1465_vm6, %v1469_v5, %v1461_v60  ;;  %v1471_v13 = vsub.f32 0.0, %v1463_v11 }
 0x2d5   : > { %v1481_v58 = vadd.f32 1.0, %v1473_v52  ;;  %v1472_v12 = vsel %vm1464_vm7, %v1468_v7, %v1460_v2  ;;  %v1470_v1 = vsub.f32 0.0, %v1462_v27 }
 0x2d6   : > { %v1480_v26 = vadd.f32 1.0, %v1472_v12  ;;  %v1475_v23 = vsel %vm1467_vm8, %v1471_v13, %v1463_v11  ;;  %v2074_v11 = vld [vmem:[%s2668_s15 + $0x10] sm:$0xff] }
 0x2d7   : > { %v1485_v29 = vmul.f32 %v1481_v58, %v1477_v8  ;;  %v1483_v14 = vadd.f32 1.0, %v1475_v23  ;;  %v1474_v37 = vsel %vm1466_vm9, %v1470_v1, %v1462_v27 }
 0x2d8   : > { %v1484_v30 = vmul.f32 %v1480_v26, %v1476_v35  ;;  %v1482_v44 = vadd.f32 1.0, %v1474_v37 }
 0x2d9   : > { %v1552_v33 = vmul.f32 %v2863_v47, %v1485_v29  ;;  %v1551_v15 = vmul.f32 %v2865_v48, %v1485_v29  ;;  %v1554_v36 = vmul.f32 %v2867_v57, %v1485_v29  ;;  %v1553_v45 = vmul.f32 %v2869_v3, %v1485_v29  ;;  %v1642_v57 = vpop.permute.xlu0 %1641 }
 0x2da   : > { %v1518_v38 = vmul.f32 %v2855_v31, %v1484_v30  ;;  %v1517_v39 = vmul.f32 %v2857_v32, %v1484_v30  ;;  %v1520_v24 = vmul.f32 %v2859_v42, %v1484_v30  ;;  %v1519_v25 = vmul.f32 %v2861_v43, %v1484_v30 }
 0x2db   : > { %v1487_v46 = vmul.f32 %v1483_v14, %v1479_v22  ;;  %v1486_v53 = vmul.f32 %v1482_v44, %v1478_v18 }
 0x2dc   : > { %v1556_v47 = vadd.f32 %v1552_v33, %v1518_v38  ;;  %v1555_v50 = vadd.f32 %v1551_v15, %v1517_v39  ;;  %v1558_v48 = vadd.f32 %v1554_v36, %v1520_v24  ;;  %v1557_v31 = vadd.f32 %v1553_v45, %v1519_v25 }
 0x2dd   : > { %v1590_v32 = vmul.f32 %v2871_v9, %v1486_v53  ;;  %v1589_v42 = vmul.f32 %v2873_v34, %v1486_v53  ;;  %v1592_v21 = vmul.f32 %v2875_v40, %v1486_v53  ;;  %v1591_v54 = vmul.f32 %v2877_v41, %v1486_v53  ;;  %v1663_v9 = vpop.permute.xlu1 %1662  ;;  %v1656_v34 = vpop.permute.xlu0 %1655 }
 0x2de   : > { %v1628_v43 = vmul.f32 %v1612_v17, %v1487_v46  ;;  %v1627_v3 = vmul.f32 %v1605_v63, %v1487_v46  ;;  %v1630_v55 = vmul.f32 %v1626_v28, %v1487_v46  ;;  %v1629_v16 = vmul.f32 %v1619_v0, %v1487_v46 }
 0x2df   : > { %v1594_v56 = vadd.f32 %v1590_v32, %v1556_v47  ;;  %v1593_v59 = vadd.f32 %v1589_v42, %v1555_v50  ;;  %v1596_v60 = vadd.f32 %v1592_v21, %v1558_v48  ;;  %v1595_v4 = vadd.f32 %v1591_v54, %v1557_v31 }
 0x2e1   : > { %v1632_v61 = vadd.f32 %v1628_v43, %v1594_v56  ;;  %v1631_v40 = vadd.f32 %v1627_v3, %v1593_v59  ;;  %v1634_v41 = vadd.f32 %v1630_v55, %v1596_v60  ;;  %v1633_v17 = vadd.f32 %v1629_v16, %v1595_v4 }
 0x2e3   : > { %v1665_v63 = vadd.f32 %v1649_v51, %v1632_v61  ;;  %v1664_v62 = vadd.f32 %v1642_v57, %v1631_v40  ;;  %v1667_v2 = vadd.f32 %v1663_v9, %v1634_v41  ;;  %v1666_v5 = vadd.f32 %v1656_v34, %v1633_v17 }
 0x2e5   : > { %v1669_v6 = vadd.f32 %v2072_v19, %v1665_v63  ;;  %v1668_v7 = vadd.f32 %v2073_v49, %v1664_v62  ;;  %v1671_v52 = vadd.f32 %v1667_v2, %v2702_v10  ;;  %v1670_v20 = vadd.f32 %v2074_v11, %v1666_v5 }
 0x2e7   : > { %1674 = vst.msk [vmem:[%s436_s28 + $0x8] sm:$0xff] %vm1672_vm10, %v1669_v6  ;;  %1673 = vst.msk [vmem:[%s436_s28] sm:$0xff] %vm1672_vm10, %v1668_v7 }
 0x2e8   : > { %1676 = vst.msk [vmem:[%s436_s28 + $0x18] sm:$0xff] %vm1672_vm10, %v1671_v52  ;;  %1675 = vst.msk [vmem:[%s436_s28 + $0x10] sm:$0xff] %vm1672_vm10, %v1670_v20 }
 0x2e9   : > { %2258 = shalt.err (!%p2255_p8)
}
 0x2ea   : > { %s2259_s15 = scalar_lea.hbm %s2907_s24, 512  ;;  %s2263_s22 = scalar_lea.hbm %s2998_s8, 1024 }
 0x2eb   : > { %p2260_p3 = scmp.ne.s32.totalorder %s2907_s24, %s2259_s15  ;;  %p2264_p0 = scmp.lt.u32.totalorder %s2907_s24, %s2998_s8 }
 0x2ec   : > { %p2265_p1 = scmp.lt.u32.totalorder %s2263_s22, %s2259_s15  ;;  %p2267_p6 = scmp.lt.u32.totalorder %s2259_s15, %s2907_s24 }
 0x2ed   : > { %p2261_p12 = pnand %p2260_p3, %p2999_p5 }
 0x2ee   : > { %p2266_p7 = por %p2265_p1, %p2264_p0 }
 0x2ef   : > { %p2262_p13 = pneg %p2261_p12 }
 0x2f0   : > { %p2268_p10 = por %p2267_p6, %p2266_p7 }
 0x2f2   : > { %p2269_p11 = pnand %p2268_p10, %p2262_p13 }
 0x2f4   : > { %2272 = shalt.err (!%p2269_p11)
}
 0x2f5   : > { %s2354_s12 = smov 128   ;;  %s2355_s17 = smov 8  }
 0x2f6   : > { %1941 = dma.vmem_to_hbm [thread:$0]  (%p2999_p5), %s2902_s21, 512, %s2907_s24, %s1678_s20, %s2354_s12, %s2354_s12, %s2355_s17  }
 0x2f7 PF: > { %s1707_s27 = sand.u32 1, %s2319_s30   ;;  %p3000_p2 = scmp.ne.s32.totalorder %s2990_s19, 0 }
 0x2f8   : > { %p3001_p4 = scmp.ge.s32.totalorder %s2339_s14, 2  ;;  %s1708_s15 = scalar_lea.sflag [#allocation4], %s1707_s27 }
 0x2fa   : > { %p1964_p9 = pnand %p3001_p4, %p3000_p2 }
 0x2fc   : > { %2314 = dma.done.wait (!%p1964_p9), %s1708_s15, 512  }
 0x2fd   : > { %2316 = vsyncadd (!%p1964_p9), %s1708_s15, 4294966784  ;;  %s28_s14 = sadd.s32 1, %s2339_s14   ;;  %s3002_s30 = smov %s2323_s10 }
 0x2fe   : > { %p25_p8 = scmp.ge.s32.totalorder %s28_s14, 4   ;;  %s3003_s10 = smov %s2327_s11 }
 0x2ff   : > { %s3004_s11 = smov %s2607_s25  ;;  %s3005_s12 = smov %s2335_s13 }
 0x300   : > { %s3006_s13 = smov %s3008_s26  ;;  %27 = sbr.rel (!%p25_p8) target bundleno = 12 (0xc), region = 127 }
 0x307   :  { %1713 = vsyncpa [#allocation3], 1 }
 0x308   :  { %1715 = vsyncpa [#allocation3 + $0x1], 1 }
 0x309   :  { %1716 = vsyncpa [#allocation6], 1 }
 0x30a   :  { %1717 = vsyncpa [#allocation9], 1 }
 0x30b   :  { %1718 = vsyncpa [#allocation12], 1 }
 0x30c   :  { %1719 = vsyncpa [#allocation4], 1 }
 0x30d   :  { %1721 = vsyncpa [#allocation4 + $0x1], 1 }

</bundles_post_ra>
